<compile_context>
chip_gen: v7x
topology: tpu7x:2x2x1
jax: 0.10.0
libtpu: 0.0.40
codegen_flags: <defaults>
</compile_context>

<pallas_src>
import jax
import jax.numpy as jnp
from jax.experimental import pallas as pl
from jax.experimental.pallas import tpu as pltpu


def _round_up(v, m):
    return ((v + m - 1) // m) * m


def _pad2(a, rows, cols, dtype):
    a = jnp.asarray(a, dtype)
    return jnp.pad(a, ((0, rows - a.shape[0]), (0, cols - a.shape[1])))


# ---------------------------------------------------------------------------
# Reference-only bilinear plane sampling (grid_sample: bilinear, border,
# align_corners=True).  The production path fuses this into the Pallas kernel
# as a one-hot MXU gather; this slow vmapped-gather version is used ONLY by
# the pure-JAX f32 reference below.
# ---------------------------------------------------------------------------
def sample_plane_feature(points_xy, c_local):
    """points_xy: (B, N, 2) in [-1, 1]; c_local: (B, C, H, W) -> (B, C, N)."""
    B, C, H, W = c_local.shape
    x = (points_xy[..., 0] + 1.0) * 0.5 * (W - 1)   # maps to W axis
    y = (points_xy[..., 1] + 1.0) * 0.5 * (H - 1)   # maps to H axis

    x0 = jnp.floor(x)
    y0 = jnp.floor(y)
    wx = x - x0
    wy = y - y0

    x0i = jnp.clip(x0.astype(jnp.int32), 0, W - 1)
    x1i = jnp.clip(x0.astype(jnp.int32) + 1, 0, W - 1)
    y0i = jnp.clip(y0.astype(jnp.int32), 0, H - 1)
    y1i = jnp.clip(y0.astype(jnp.int32) + 1, 0, H - 1)

    def gather_one(feat, yi, xi):        # feat: (C, H, W), yi/xi: (N,)
        return feat[:, yi, xi]           # -> (C, N)

    gather = jax.vmap(gather_one)

    f00 = gather(c_local, y0i, x0i)
    f01 = gather(c_local, y0i, x1i)
    f10 = gather(c_local, y1i, x0i)
    f11 = gather(c_local, y1i, x1i)

    wx = wx[:, None, :]
    wy = wy[:, None, :]
    top = f00 * (1.0 - wx) + f01 * wx
    bot = f10 * (1.0 - wx) + f11 * wx
    return top * (1.0 - wy) + bot * wy   # (B, C, N)


# ---------------------------------------------------------------------------
# Fused Pallas kernel: bilinear sampling (one-hot MXU gather)
#                      + 5x(Linear+ReLU) + fc_out
# ---------------------------------------------------------------------------
def mlp_pallas(points_xy, c_flat, c, params, z_resolution, feat_h, feat_w, *,
               tm=512, single_buffer_weights=None):
    """points_xy: (B, N, dim) f32; c_flat: (B, H*W, C_local) bf16;
    c: (B, C_global+3) f32  ->  (B, N, z_resolution) f32."""
    B, N, dim = points_xy.shape
    _, HW, C_loc = c_flat.shape
    assert HW == feat_h * feat_w
    assert len(params) == 6, "expected 5 hidden Linear layers + fc_out"

    w0_full, b0 = params[0]
    hidden_params = params[1:-1]
    wo, bo = params[-1]
    Hd = w0_full.shape[1]
    assert w0_full.shape[0] == dim + C_loc + c.shape[-1]

    # Lane-dense padding of the hidden / fc_out widths only (mult. of 128).
    H_pad = _round_up(Hd, 128)
    Z_pad = _round_up(z_resolution, 128)

    # ---- row tile ---------------------------------------------------------
    tm = max(8, min(tm, _round_up(N, 8)))
    n_tiles = -(-N // tm)
    # v7x has 2 TensorCores: keep >= 2 parallel grid steps when there is work.
    if B * n_tiles < 2 and N > 8:
        tm = _round_up(-(-N // 2), 8)
        n_tiles = -(-N // tm)
    N_pad = n_tiles * tm

    # ---- fold global conditioning into a per-batch layer-0 bias -----------
    w0_glob = w0_full[dim + C_loc:]
    g = (c.astype(jnp.float32) @ w0_glob.astype(jnp.float32)
         + b0.astype(jnp.float32))                                 # (B, Hd)
    g = jnp.pad(g, ((0, 0), (0, H_pad - Hd)))[:, None, :]          # (B, 1, H_pad)

    # ---- zero-padded weights (bf16 MXU operands, f32 biases) --------------
    weight_args = [
        _pad2(w0_full[:dim], dim, H_pad, jnp.float32),             # w0_xy (f32)
        _pad2(w0_full[dim:dim + C_loc], C_loc, H_pad, jnp.bfloat16),  # w0_loc
    ]
    weight_shapes = [(dim, H_pad), (C_loc, H_pad)]
    for (w, bvec) in hidden_params:
        weight_args += [_pad2(w, H_pad, H_pad, jnp.bfloat16),
                        _pad2(bvec.reshape(1, -1), 1, H_pad, jnp.float32)]
        weight_shapes += [(H_pad, H_pad), (1, H_pad)]
    weight_args += [_pad2(wo, H_pad, Z_pad, jnp.bfloat16),
                    _pad2(bo.reshape(1, -1), 1, Z_pad, jnp.float32)]
    weight_shapes += [(H_pad, Z_pad), (1, Z_pad)]

    # Points: only the row axis is padded; per-point HBM read is 8 bytes.
    pts_p = jnp.pad(points_xy.astype(jnp.float32),
                    ((0, 0), (0, N_pad - N), (0, 0)))              # (B, N_pad, dim)

    # ---- kernel ------------------------------------------------------------
    def kernel(pts_ref, cflat_ref, g_ref,
               w0xy, w0loc, w1, b1, w2, b2, w3, b3, w4, b4, wo_r, bo_r,
               o_ref):
        pts = pts_ref[0]                                    # (tm, dim) f32
        rows = pts.shape[0]

        # Bilinear plane sampling fused as a one-hot MXU gather
        # (grid_sample: bilinear, padding_mode='border', align_corners=True).
        x = (pts[:, 0:1] + 1.0) * (0.5 * (feat_w - 1))
        y = (pts[:, 1:2] + 1.0) * (0.5 * (feat_h - 1))
        x0 = jnp.floor(x)
        y0 = jnp.floor(y)
        wx = x - x0
        wy = y - y0
        x0i = jnp.clip(x0, 0.0, feat_w - 1.0).astype(jnp.int32)
        x1i = jnp.clip(x0 + 1.0, 0.0, feat_w - 1.0).astype(jnp.int32)
        y0i = jnp.clip(y0, 0.0, feat_h - 1.0).astype(jnp.int32)
        y1i = jnp.clip(y0 + 1.0, 0.0, feat_h - 1.0).astype(jnp.int32)
        lane = jax.lax.broadcasted_iota(jnp.int32, (rows, HW), 1)
        onehot = (
            jnp.where(lane == y0i * feat_w + x0i, (1.0 - wx) * (1.0 - wy), 0.0)
            + jnp.where(lane == y0i * feat_w + x1i, wx * (1.0 - wy), 0.0)
            + jnp.where(lane == y1i * feat_w + x0i, (1.0 - wx) * wy, 0.0)
            + jnp.where(lane == y1i * feat_w + x1i, wx * wy, 0.0))
        loc = jnp.dot(onehot.astype(jnp.bfloat16), cflat_ref[0],
                      preferred_element_type=jnp.float32)   # (tm, C_loc) f32

        # Layer 0: local features on the MXU; the tiny xy contribution as a
        # f32 VPU outer product; global conditioning pre-folded into g.
        h = jnp.dot(loc.astype(jnp.bfloat16), w0loc[...],
                    preferred_element_type=jnp.float32) + g_ref[0]
        w0xy_v = w0xy[...]                                  # (dim, H_pad) f32
        for d in range(dim):
            h = h + pts[:, d:d + 1] * w0xy_v[d:d + 1, :]
        h = jnp.maximum(h, 0.0)

        def lin_relu(hh, w_ref, b_ref):
            acc = jnp.dot(hh.astype(jnp.bfloat16), w_ref[...],
                          preferred_element_type=jnp.float32)
            return jnp.maximum(acc + b_ref[...], 0.0)

        h = lin_relu(h, w1, b1)
        h = lin_relu(h, w2, b2)
        h = lin_relu(h, w3, b3)
        h = lin_relu(h, w4, b4)

        out = jnp.dot(h.astype(jnp.bfloat16), wo_r[...],
                      preferred_element_type=jnp.float32) + bo_r[...]
        # Only the real z_resolution lanes are written back (unpadded output).
        o_ref[0] = out[:, :z_resolution].astype(o_ref.dtype)

    # ---- cost / VMEM accounting --------------------------------------------
    def _tile_bytes(r, cc, itemsize):
        return _round_up(r, 8) * _round_up(cc, 128) * itemsize

    flops = 2 * B * N_pad * (HW * C_loc + C_loc * H_pad
                             + 4 * H_pad * H_pad + H_pad * Z_pad)
    bytes_accessed = (int(pts_p.size) * 4 + int(c_flat.size) * 2
                      + int(g.size) * 4
                      + sum(int(a.size) * a.dtype.itemsize for a in weight_args)
                      + B * N_pad * z_resolution * 4)
    cost = pl.CostEstimate(flops=int(flops), transcendentals=0,
                           bytes_accessed=int(bytes_accessed))

    weight_vmem = sum(_tile_bytes(a.shape[0], a.shape[1], a.dtype.itemsize)
                      for a in weight_args)
    vmem_est = (2 * weight_vmem                         # upper bound (dbl-buffered)
                + 2 * _tile_bytes(tm, dim, 4)           # points
                + 2 * _tile_bytes(HW, C_loc, 2)         # per-batch plane features
                + 2 * _tile_bytes(1, H_pad, 4)          # folded global bias
                + 2 * _tile_bytes(tm, z_resolution, 4)  # output
                + 2 * _tile_bytes(tm, HW, 4)            # one-hot gather temporaries
                + 4 * _tile_bytes(tm, H_pad, 4))        # activation headroom
    cp_kwargs = dict(dimension_semantics=("parallel", "parallel"))
    if vmem_est > (16 << 20):
        # Generation-aware cap: ~48 MiB on v7x (64 MiB phys), ~96 MiB on v5e/v6e.
        try:
            phys_vmem = int(getattr(pltpu.get_tpu_info(),
                                    "vmem_capacity_bytes", 64 << 20))
        except Exception:
            phys_vmem = 64 << 20
        cp_kwargs["vmem_limit_bytes"] = int(min(vmem_est + (8 << 20),
                                                (phys_vmem * 3) // 4))

    out_shape = jax.ShapeDtypeStruct((B, N_pad, z_resolution), jnp.float32)

    def _run(single_buffer):
        if single_buffer:
            # Constant index_maps -> never re-DMA'd; one VMEM buffer suffices.
            wspecs = [pl.BlockSpec(s, lambda b, i: (0, 0),
                                   pipeline_mode=pl.Buffered(1))
                      for s in weight_shapes]
        else:
            wspecs = [pl.BlockSpec(s, lambda b, i: (0, 0))
                      for s in weight_shapes]
        return pl.pallas_call(
            kernel,
            out_shape=out_shape,
            grid_spec=pltpu.PrefetchScalarGridSpec(
                num_scalar_prefetch=0,
                grid=(B, n_tiles),
                in_specs=[pl.BlockSpec((1, tm, dim), lambda b, i: (b, i, 0)),
                          pl.BlockSpec((1, HW, C_loc), lambda b, i: (b, 0, 0)),
                          pl.BlockSpec((1, 1, H_pad), lambda b, i: (b, 0, 0))]
                         + wspecs,
                out_specs=pl.BlockSpec((1, tm, z_resolution),
                                       lambda b, i: (b, i, 0)),
            ),
            compiler_params=pltpu.CompilerParams(**cp_kwargs),
            cost_estimate=cost,
        )(pts_p, c_flat, g, *weight_args)

    if single_buffer_weights is None:
        try:
            out = _run(True)
        except Exception:
            # pipeline_mode=pl.Buffered(1) unsupported on this jax/backend:
            # fall back to default double-buffered weights (same semantics).
            out = _run(False)
    else:
        out = _run(bool(single_buffer_weights))

    return out[:, :N] if N_pad != N else out


# ---------------------------------------------------------------------------
# Decoder_simple forward (c_dim_local != 0, input3='cam_ori', normalize=False,
# positional_encoding=False -- the module defaults)
# ---------------------------------------------------------------------------
def decoder_simple_forward(scale_factor, points_xy, c_global, c_local, params,
                           z_resolution, *, tm=512):
    # TODO(synk): normalize=True / positional_encoding=True / other `input3`
    # modes / c_dim_local == 0 branches are not implemented (defaults only).
    B, C_loc, Hh, Ww = c_local.shape
    # One cheap, N-independent pass over the feature maps: flatten the spatial
    # grid, put channels on the lane axis and cast to bf16.  The bilinear
    # gather runs inside the kernel, so no (B, N, C) intermediate, transpose,
    # concat or pad ever touches HBM.
    c_flat = jnp.transpose(c_local.reshape(B, C_loc, Hh * Ww),
                           (0, 2, 1)).astype(jnp.bfloat16)        # (B, HW, C)
    c = jnp.concatenate([c_global, scale_factor], axis=-1)        # (B, C_glob+3)
    return mlp_pallas(points_xy, c_flat, c, params, z_resolution, Hh, Ww, tm=tm)


def init_params(key, geo_in_dim, c_dim, hidden_size, z_resolution):
    """Deterministic parameter init; weights stored as (in, out)."""
    dims = [(geo_in_dim + c_dim, hidden_size)] + \
           [(hidden_size, hidden_size)] * 4 + \
           [(hidden_size, z_resolution)]
    params = []
    for (fin, fout) in dims:
        key, kw, kb = jax.random.split(key, 3)
        bound = 1.0 / jnp.sqrt(fin)
        w = jax.random.uniform(kw, (fin, fout), jnp.float32, -bound, bound)
        b = jax.random.uniform(kb, (fout,), jnp.float32, -bound, bound)
        params.append((w, b))
    return params


def reference_forward(scale_factor, points_xy, c_global, c_local, params,
                      z_resolution):
    """Pure-JAX f32 reference of the same forward pass (PyTorch semantics)."""
    B, N, _ = points_xy.shape
    c_loc = jnp.transpose(sample_plane_feature(points_xy, c_local), (0, 2, 1))
    net_ = jnp.concatenate([points_xy, c_loc], axis=-1)
    c = jnp.concatenate([c_global, scale_factor], axis=-1)
    c = jnp.broadcast_to(c[:, None, :], (B, N, c.shape[-1]))
    h = jnp.concatenate([net_, c], axis=-1)
    for (w, b) in params[:-1]:
        h = jnp.maximum(h @ w + b, 0.0)
    wo, bo = params[-1]
    return h @ wo + bo


if __name__ == "__main__":
    # Small, consistent shapes
    B, N = 2, 24
    dim = 2
    c_dim_local = 8
    c_dim_global = 8
    hidden_size = 32
    z_resolution = 8
    H = W = 16

    geo_in_dim = c_dim_local + dim          # no positional encoding
    c_dim = c_dim_global + 3                # input3 == 'cam_ori'

    key = jax.random.PRNGKey(0)
    k1, k2, k3, k4, kp = jax.random.split(key, 5)

    points_xy = jax.random.uniform(k1, (B, N, dim), jnp.float32, -1.0, 1.0)
    c_local = jax.random.normal(k2, (B, c_dim_local, H, W), jnp.float32)
    c_global = jax.random.normal(k3, (B, c_dim_global), jnp.float32)
    scale_factor = jax.random.normal(k4, (B, 3), jnp.float32)   # cam_ori (3,)

    params = init_params(kp, geo_in_dim, c_dim, hidden_size, z_resolution)

    # Small tm so the test exercises multiple row tiles and N_pad > N
    # (production default is tm=512).
    out = decoder_simple_forward(scale_factor, points_xy, c_global, c_local,
                                 params, z_resolution, tm=16)
    out = jax.block_until_ready(out)

    ref = reference_forward(scale_factor, points_xy, c_global, c_local,
                            params, z_resolution)
    assert out.shape == (B, N, z_resolution)
    # bf16 MXU operands (weights, activations, bilinear weights) vs f32 ref.
    assert jnp.allclose(out, ref, atol=3e-2, rtol=3e-2), "mismatch vs reference"

    print("KERNEL_OK")
</pallas_src>

<mosaic_0001>
module attributes {stable_mosaic.version = 11 : i64} {
  func.func @kernel(%arg0: i32, %arg1: i32, %arg2: memref<1x16x2xf32, #tpu.memory_space<vmem>>, %arg3: memref<1x256x8xbf16, #tpu.memory_space<vmem>>, %arg4: memref<1x1x128xf32, #tpu.memory_space<vmem>>, %arg5: memref<2x128xf32, #tpu.memory_space<vmem>>, %arg6: memref<8x128xbf16, #tpu.memory_space<vmem>>, %arg7: memref<128x128xbf16, #tpu.memory_space<vmem>>, %arg8: memref<1x128xf32, #tpu.memory_space<vmem>>, %arg9: memref<128x128xbf16, #tpu.memory_space<vmem>>, %arg10: memref<1x128xf32, #tpu.memory_space<vmem>>, %arg11: memref<128x128xbf16, #tpu.memory_space<vmem>>, %arg12: memref<1x128xf32, #tpu.memory_space<vmem>>, %arg13: memref<128x128xbf16, #tpu.memory_space<vmem>>, %arg14: memref<1x128xf32, #tpu.memory_space<vmem>>, %arg15: memref<128x128xbf16, #tpu.memory_space<vmem>>, %arg16: memref<1x128xf32, #tpu.memory_space<vmem>>, %arg17: memref<1x16x8xf32, #tpu.memory_space<vmem>>) attributes {dimension_semantics = [#tpu.dimension_semantics<parallel>, #tpu.dimension_semantics<parallel>], iteration_bounds = array<i64: 2, 2>, scalar_prefetch = 0 : i64, scratch_operands = 0 : i64, tpu.core_type = #tpu.core_type<tc>, window_params = [{transform_indices = @transform_0, window_bounds = array<i64: 1, 16, 2>}, {transform_indices = @transform_1, window_bounds = array<i64: 1, 256, 8>}, {transform_indices = @transform_2, window_bounds = array<i64: 1, 1, 128>}, {pipeline_mode = #tpu.pipeline_mode<synchronous>, transform_indices = @transform_3, window_bounds = array<i64: 2, 128>}, {pipeline_mode = #tpu.pipeline_mode<synchronous>, transform_indices = @transform_4, window_bounds = array<i64: 8, 128>}, {pipeline_mode = #tpu.pipeline_mode<synchronous>, transform_indices = @transform_5, window_bounds = array<i64: 128, 128>}, {pipeline_mode = #tpu.pipeline_mode<synchronous>, transform_indices = @transform_6, window_bounds = array<i64: 1, 128>}, {pipeline_mode = #tpu.pipeline_mode<synchronous>, transform_indices = @transform_7, window_bounds = array<i64: 128, 128>}, {pipeline_mode = #tpu.pipeline_mode<synchronous>, transform_indices = @transform_8, window_bounds = array<i64: 1, 128>}, {pipeline_mode = #tpu.pipeline_mode<synchronous>, transform_indices = @transform_9, window_bounds = array<i64: 128, 128>}, {pipeline_mode = #tpu.pipeline_mode<synchronous>, transform_indices = @transform_10, window_bounds = array<i64: 1, 128>}, {pipeline_mode = #tpu.pipeline_mode<synchronous>, transform_indices = @transform_11, window_bounds = array<i64: 128, 128>}, {pipeline_mode = #tpu.pipeline_mode<synchronous>, transform_indices = @transform_12, window_bounds = array<i64: 1, 128>}, {pipeline_mode = #tpu.pipeline_mode<synchronous>, transform_indices = @transform_13, window_bounds = array<i64: 128, 128>}, {pipeline_mode = #tpu.pipeline_mode<synchronous>, transform_indices = @transform_14, window_bounds = array<i64: 1, 128>}, {transform_indices = @transform_15, window_bounds = array<i64: 1, 16, 8>}]} {
    %c0 = arith.constant 0 : index
    %c0_0 = arith.constant 0 : index
    %c0_1 = arith.constant 0 : index
    %0 = vector.load %arg2[%c0, %c0_0, %c0_1] : memref<1x16x2xf32, #tpu.memory_space<vmem>>, vector<1x16x2xf32>
    %1 = vector.shape_cast %0 : vector<1x16x2xf32> to vector<16x2xf32>
    %2 = vector.extract_strided_slice %1 {offsets = [0, 0], sizes = [16, 1], strides = [1, 1]} : vector<16x2xf32> to vector<16x1xf32>
    %cst = arith.constant 1.000000e+00 : f32
    %3 = vector.broadcast %cst : f32 to vector<16x1xf32>
    %4 = arith.addf %2, %3 : vector<16x1xf32>
    %cst_2 = arith.constant 7.500000e+00 : f32
    %5 = vector.broadcast %cst_2 : f32 to vector<16x1xf32>
    %6 = arith.mulf %4, %5 : vector<16x1xf32>
    %7 = vector.extract_strided_slice %1 {offsets = [0, 1], sizes = [16, 1], strides = [1, 1]} : vector<16x2xf32> to vector<16x1xf32>
    %cst_3 = arith.constant 1.000000e+00 : f32
    %8 = vector.broadcast %cst_3 : f32 to vector<16x1xf32>
    %9 = arith.addf %7, %8 : vector<16x1xf32>
    %cst_4 = arith.constant 7.500000e+00 : f32
    %10 = vector.broadcast %cst_4 : f32 to vector<16x1xf32>
    %11 = arith.mulf %9, %10 : vector<16x1xf32>
    %12 = math.floor %6 : vector<16x1xf32>
    %13 = math.floor %11 : vector<16x1xf32>
    %14 = arith.subf %6, %12 : vector<16x1xf32>
    %15 = arith.subf %11, %13 : vector<16x1xf32>
    %cst_5 = arith.constant 0.000000e+00 : f32
    %cst_6 = arith.constant 1.500000e+01 : f32
    %16 = vector.broadcast %cst_5 : f32 to vector<16x1xf32>
    %17 = arith.maximumf %16, %12 : vector<16x1xf32>
    %18 = vector.broadcast %cst_6 : f32 to vector<16x1xf32>
    %19 = arith.minimumf %18, %17 : vector<16x1xf32>
    %20 = arith.fptosi %19 : vector<16x1xf32> to vector<16x1xi32>
    %cst_7 = arith.constant 1.000000e+00 : f32
    %21 = vector.broadcast %cst_7 : f32 to vector<16x1xf32>
    %22 = arith.addf %12, %21 : vector<16x1xf32>
    %cst_8 = arith.constant 0.000000e+00 : f32
    %cst_9 = arith.constant 1.500000e+01 : f32
    %23 = vector.broadcast %cst_8 : f32 to vector<16x1xf32>
    %24 = arith.maximumf %23, %22 : vector<16x1xf32>
    %25 = vector.broadcast %cst_9 : f32 to vector<16x1xf32>
    %26 = arith.minimumf %25, %24 : vector<16x1xf32>
    %27 = arith.fptosi %26 : vector<16x1xf32> to vector<16x1xi32>
    %cst_10 = arith.constant 0.000000e+00 : f32
    %cst_11 = arith.constant 1.500000e+01 : f32
    %28 = vector.broadcast %cst_10 : f32 to vector<16x1xf32>
    %29 = arith.maximumf %28, %13 : vector<16x1xf32>
    %30 = vector.broadcast %cst_11 : f32 to vector<16x1xf32>
    %31 = arith.minimumf %30, %29 : vector<16x1xf32>
    %32 = arith.fptosi %31 : vector<16x1xf32> to vector<16x1xi32>
    %cst_12 = arith.constant 1.000000e+00 : f32
    %33 = vector.broadcast %cst_12 : f32 to vector<16x1xf32>
    %34 = arith.addf %13, %33 : vector<16x1xf32>
    %cst_13 = arith.constant 0.000000e+00 : f32
    %cst_14 = arith.constant 1.500000e+01 : f32
    %35 = vector.broadcast %cst_13 : f32 to vector<16x1xf32>
    %36 = arith.maximumf %35, %34 : vector<16x1xf32>
    %37 = vector.broadcast %cst_14 : f32 to vector<16x1xf32>
    %38 = arith.minimumf %37, %36 : vector<16x1xf32>
    %39 = arith.fptosi %38 : vector<16x1xf32> to vector<16x1xi32>
    %40 = tpu.iota {dimensions = array<i32: 1>} : vector<16x256xi32>
    %c16_i32 = arith.constant 16 : i32
    %41 = vector.broadcast %c16_i32 : i32 to vector<16x1xi32>
    %42 = arith.muli %32, %41 : vector<16x1xi32>
    %43 = arith.addi %42, %20 : vector<16x1xi32>
    %44 = vector.broadcast %43 : vector<16x1xi32> to vector<16x256xi32>
    %45 = arith.cmpi eq, %40, %44 : vector<16x256xi32>
    %cst_15 = arith.constant 1.000000e+00 : f32
    %46 = vector.broadcast %cst_15 : f32 to vector<16x1xf32>
    %47 = arith.subf %46, %14 : vector<16x1xf32>
    %cst_16 = arith.constant 1.000000e+00 : f32
    %48 = vector.broadcast %cst_16 : f32 to vector<16x1xf32>
    %49 = arith.subf %48, %15 : vector<16x1xf32>
    %50 = arith.mulf %47, %49 : vector<16x1xf32>
    %cst_17 = arith.constant 0.000000e+00 : f32
    %51 = vector.shape_cast %50 : vector<16x1xf32> to vector<16x1xf32>
    %52 = vector.broadcast %51 : vector<16x1xf32> to vector<16x256xf32>
    %53 = vector.broadcast %cst_17 : f32 to vector<16x256xf32>
    %54 = arith.select %45, %52, %53 : vector<16x256xi1>, vector<16x256xf32>
    %c16_i32_18 = arith.constant 16 : i32
    %55 = vector.broadcast %c16_i32_18 : i32 to vector<16x1xi32>
    %56 = arith.muli %32, %55 : vector<16x1xi32>
    %57 = arith.addi %56, %27 : vector<16x1xi32>
    %58 = vector.broadcast %57 : vector<16x1xi32> to vector<16x256xi32>
    %59 = arith.cmpi eq, %40, %58 : vector<16x256xi32>
    %cst_19 = arith.constant 1.000000e+00 : f32
    %60 = vector.broadcast %cst_19 : f32 to vector<16x1xf32>
    %61 = arith.subf %60, %15 : vector<16x1xf32>
    %62 = arith.mulf %14, %61 : vector<16x1xf32>
    %cst_20 = arith.constant 0.000000e+00 : f32
    %63 = vector.shape_cast %62 : vector<16x1xf32> to vector<16x1xf32>
    %64 = vector.broadcast %63 : vector<16x1xf32> to vector<16x256xf32>
    %65 = vector.broadcast %cst_20 : f32 to vector<16x256xf32>
    %66 = arith.select %59, %64, %65 : vector<16x256xi1>, vector<16x256xf32>
    %67 = arith.addf %54, %66 : vector<16x256xf32>
    %c16_i32_21 = arith.constant 16 : i32
    %68 = vector.broadcast %c16_i32_21 : i32 to vector<16x1xi32>
    %69 = arith.muli %39, %68 : vector<16x1xi32>
    %70 = arith.addi %69, %20 : vector<16x1xi32>
    %71 = vector.broadcast %70 : vector<16x1xi32> to vector<16x256xi32>
    %72 = arith.cmpi eq, %40, %71 : vector<16x256xi32>
    %cst_22 = arith.constant 1.000000e+00 : f32
    %73 = vector.broadcast %cst_22 : f32 to vector<16x1xf32>
    %74 = arith.subf %73, %14 : vector<16x1xf32>
    %75 = arith.mulf %74, %15 : vector<16x1xf32>
    %cst_23 = arith.constant 0.000000e+00 : f32
    %76 = vector.shape_cast %75 : vector<16x1xf32> to vector<16x1xf32>
    %77 = vector.broadcast %76 : vector<16x1xf32> to vector<16x256xf32>
    %78 = vector.broadcast %cst_23 : f32 to vector<16x256xf32>
    %79 = arith.select %72, %77, %78 : vector<16x256xi1>, vector<16x256xf32>
    %80 = arith.addf %67, %79 : vector<16x256xf32>
    %c16_i32_24 = arith.constant 16 : i32
    %81 = vector.broadcast %c16_i32_24 : i32 to vector<16x1xi32>
    %82 = arith.muli %39, %81 : vector<16x1xi32>
    %83 = arith.addi %82, %27 : vector<16x1xi32>
    %84 = vector.broadcast %83 : vector<16x1xi32> to vector<16x256xi32>
    %85 = arith.cmpi eq, %40, %84 : vector<16x256xi32>
    %86 = arith.mulf %14, %15 : vector<16x1xf32>
    %cst_25 = arith.constant 0.000000e+00 : f32
    %87 = vector.shape_cast %86 : vector<16x1xf32> to vector<16x1xf32>
    %88 = vector.broadcast %87 : vector<16x1xf32> to vector<16x256xf32>
    %89 = vector.broadcast %cst_25 : f32 to vector<16x256xf32>
    %90 = arith.select %85, %88, %89 : vector<16x256xi1>, vector<16x256xf32>
    %91 = arith.addf %80, %90 : vector<16x256xf32>
    %92 = arith.truncf %91 : vector<16x256xf32> to vector<16x256xbf16>
    %c0_26 = arith.constant 0 : index
    %c0_27 = arith.constant 0 : index
    %c0_28 = arith.constant 0 : index
    %93 = vector.load %arg3[%c0_26, %c0_27, %c0_28] : memref<1x256x8xbf16, #tpu.memory_space<vmem>>, vector<1x256x8xbf16>
    %94 = vector.shape_cast %93 : vector<1x256x8xbf16> to vector<256x8xbf16>
    %cst_29 = arith.constant dense<0.000000e+00> : vector<16x8xf32>
    %95 = tpu.matmul %92, %94, %cst_29 {dimension_numbers = #tpu.dot_dimension_numbers<[1], [0], [0], [1], [0, 0, 1, 1], [], []>} : vector<16x256xbf16>, vector<256x8xbf16>, vector<16x8xf32> -> vector<16x8xf32>
    %96 = arith.truncf %95 : vector<16x8xf32> to vector<16x8xbf16>
    %c0_30 = arith.constant 0 : index
    %c0_31 = arith.constant 0 : index
    %97 = vector.load %arg6[%c0_30, %c0_31] : memref<8x128xbf16, #tpu.memory_space<vmem>>, vector<8x128xbf16>
    %cst_32 = arith.constant dense<0.000000e+00> : vector<16x128xf32>
    %98 = tpu.matmul %96, %97, %cst_32 {dimension_numbers = #tpu.dot_dimension_numbers<[1], [0], [0], [1], [0, 0, 1, 1], [], []>} : vector<16x8xbf16>, vector<8x128xbf16>, vector<16x128xf32> -> vector<16x128xf32>
    %c0_33 = arith.constant 0 : index
    %c0_34 = arith.constant 0 : index
    %c0_35 = arith.constant 0 : index
    %99 = vector.load %arg4[%c0_33, %c0_34, %c0_35] : memref<1x1x128xf32, #tpu.memory_space<vmem>>, vector<1x1x128xf32>
    %100 = vector.shape_cast %99 : vector<1x1x128xf32> to vector<1x128xf32>
    %101 = vector.broadcast %100 : vector<1x128xf32> to vector<16x128xf32>
    %102 = arith.addf %98, %101 : vector<16x128xf32>
    %c0_36 = arith.constant 0 : index
    %c0_37 = arith.constant 0 : index
    %103 = vector.load %arg5[%c0_36, %c0_37] : memref<2x128xf32, #tpu.memory_space<vmem>>, vector<2x128xf32>
    %104 = vector.extract_strided_slice %1 {offsets = [0, 0], sizes = [16, 1], strides = [1, 1]} : vector<16x2xf32> to vector<16x1xf32>
    %105 = vector.extract_strided_slice %103 {offsets = [0, 0], sizes = [1, 128], strides = [1, 1]} : vector<2x128xf32> to vector<1x128xf32>
    %106 = vector.broadcast %104 : vector<16x1xf32> to vector<16x128xf32>
    %107 = vector.broadcast %105 : vector<1x128xf32> to vector<16x128xf32>
    %108 = arith.mulf %106, %107 : vector<16x128xf32>
    %109 = arith.addf %102, %108 : vector<16x128xf32>
    %110 = vector.extract_strided_slice %1 {offsets = [0, 1], sizes = [16, 1], strides = [1, 1]} : vector<16x2xf32> to vector<16x1xf32>
    %111 = vector.extract_strided_slice %103 {offsets = [1, 0], sizes = [1, 128], strides = [1, 1]} : vector<2x128xf32> to vector<1x128xf32>
    %112 = vector.broadcast %110 : vector<16x1xf32> to vector<16x128xf32>
    %113 = vector.broadcast %111 : vector<1x128xf32> to vector<16x128xf32>
    %114 = arith.mulf %112, %113 : vector<16x128xf32>
    %115 = arith.addf %109, %114 : vector<16x128xf32>
    %cst_38 = arith.constant 0.000000e+00 : f32
    %116 = vector.broadcast %cst_38 : f32 to vector<16x128xf32>
    %117 = arith.maximumf %115, %116 : vector<16x128xf32>
    %118 = arith.truncf %117 : vector<16x128xf32> to vector<16x128xbf16>
    %c0_39 = arith.constant 0 : index
    %c0_40 = arith.constant 0 : index
    %119 = vector.load %arg7[%c0_39, %c0_40] : memref<128x128xbf16, #tpu.memory_space<vmem>>, vector<128x128xbf16>
    %cst_41 = arith.constant dense<0.000000e+00> : vector<16x128xf32>
    %120 = tpu.matmul %118, %119, %cst_41 {dimension_numbers = #tpu.dot_dimension_numbers<[1], [0], [0], [1], [0, 0, 1, 1], [], []>} : vector<16x128xbf16>, vector<128x128xbf16>, vector<16x128xf32> -> vector<16x128xf32>
    %c0_42 = arith.constant 0 : index
    %c0_43 = arith.constant 0 : index
    %121 = vector.load %arg8[%c0_42, %c0_43] : memref<1x128xf32, #tpu.memory_space<vmem>>, vector<1x128xf32>
    %122 = vector.broadcast %121 : vector<1x128xf32> to vector<16x128xf32>
    %123 = arith.addf %120, %122 : vector<16x128xf32>
    %cst_44 = arith.constant 0.000000e+00 : f32
    %124 = vector.broadcast %cst_44 : f32 to vector<16x128xf32>
    %125 = arith.maximumf %123, %124 : vector<16x128xf32>
    %126 = arith.truncf %125 : vector<16x128xf32> to vector<16x128xbf16>
    %c0_45 = arith.constant 0 : index
    %c0_46 = arith.constant 0 : index
    %127 = vector.load %arg9[%c0_45, %c0_46] : memref<128x128xbf16, #tpu.memory_space<vmem>>, vector<128x128xbf16>
    %cst_47 = arith.constant dense<0.000000e+00> : vector<16x128xf32>
    %128 = tpu.matmul %126, %127, %cst_47 {dimension_numbers = #tpu.dot_dimension_numbers<[1], [0], [0], [1], [0, 0, 1, 1], [], []>} : vector<16x128xbf16>, vector<128x128xbf16>, vector<16x128xf32> -> vector<16x128xf32>
    %c0_48 = arith.constant 0 : index
    %c0_49 = arith.constant 0 : index
    %129 = vector.load %arg10[%c0_48, %c0_49] : memref<1x128xf32, #tpu.memory_space<vmem>>, vector<1x128xf32>
    %130 = vector.broadcast %129 : vector<1x128xf32> to vector<16x128xf32>
    %131 = arith.addf %128, %130 : vector<16x128xf32>
    %cst_50 = arith.constant 0.000000e+00 : f32
    %132 = vector.broadcast %cst_50 : f32 to vector<16x128xf32>
    %133 = arith.maximumf %131, %132 : vector<16x128xf32>
    %134 = arith.truncf %133 : vector<16x128xf32> to vector<16x128xbf16>
    %c0_51 = arith.constant 0 : index
    %c0_52 = arith.constant 0 : index
    %135 = vector.load %arg11[%c0_51, %c0_52] : memref<128x128xbf16, #tpu.memory_space<vmem>>, vector<128x128xbf16>
    %cst_53 = arith.constant dense<0.000000e+00> : vector<16x128xf32>
    %136 = tpu.matmul %134, %135, %cst_53 {dimension_numbers = #tpu.dot_dimension_numbers<[1], [0], [0], [1], [0, 0, 1, 1], [], []>} : vector<16x128xbf16>, vector<128x128xbf16>, vector<16x128xf32> -> vector<16x128xf32>
    %c0_54 = arith.constant 0 : index
    %c0_55 = arith.constant 0 : index
    %137 = vector.load %arg12[%c0_54, %c0_55] : memref<1x128xf32, #tpu.memory_space<vmem>>, vector<1x128xf32>
    %138 = vector.broadcast %137 : vector<1x128xf32> to vector<16x128xf32>
    %139 = arith.addf %136, %138 : vector<16x128xf32>
    %cst_56 = arith.constant 0.000000e+00 : f32
    %140 = vector.broadcast %cst_56 : f32 to vector<16x128xf32>
    %141 = arith.maximumf %139, %140 : vector<16x128xf32>
    %142 = arith.truncf %141 : vector<16x128xf32> to vector<16x128xbf16>
    %c0_57 = arith.constant 0 : index
    %c0_58 = arith.constant 0 : index
    %143 = vector.load %arg13[%c0_57, %c0_58] : memref<128x128xbf16, #tpu.memory_space<vmem>>, vector<128x128xbf16>
    %cst_59 = arith.constant dense<0.000000e+00> : vector<16x128xf32>
    %144 = tpu.matmul %142, %143, %cst_59 {dimension_numbers = #tpu.dot_dimension_numbers<[1], [0], [0], [1], [0, 0, 1, 1], [], []>} : vector<16x128xbf16>, vector<128x128xbf16>, vector<16x128xf32> -> vector<16x128xf32>
    %c0_60 = arith.constant 0 : index
    %c0_61 = arith.constant 0 : index
    %145 = vector.load %arg14[%c0_60, %c0_61] : memref<1x128xf32, #tpu.memory_space<vmem>>, vector<1x128xf32>
    %146 = vector.broadcast %145 : vector<1x128xf32> to vector<16x128xf32>
    %147 = arith.addf %144, %146 : vector<16x128xf32>
    %cst_62 = arith.constant 0.000000e+00 : f32
    %148 = vector.broadcast %cst_62 : f32 to vector<16x128xf32>
    %149 = arith.maximumf %147, %148 : vector<16x128xf32>
    %150 = arith.truncf %149 : vector<16x128xf32> to vector<16x128xbf16>
    %c0_63 = arith.constant 0 : index
    %c0_64 = arith.constant 0 : index
    %151 = vector.load %arg15[%c0_63, %c0_64] : memref<128x128xbf16, #tpu.memory_space<vmem>>, vector<128x128xbf16>
    %cst_65 = arith.constant dense<0.000000e+00> : vector<16x128xf32>
    %152 = tpu.matmul %150, %151, %cst_65 {dimension_numbers = #tpu.dot_dimension_numbers<[1], [0], [0], [1], [0, 0, 1, 1], [], []>} : vector<16x128xbf16>, vector<128x128xbf16>, vector<16x128xf32> -> vector<16x128xf32>
    %c0_66 = arith.constant 0 : index
    %c0_67 = arith.constant 0 : index
    %153 = vector.load %arg16[%c0_66, %c0_67] : memref<1x128xf32, #tpu.memory_space<vmem>>, vector<1x128xf32>
    %154 = vector.broadcast %153 : vector<1x128xf32> to vector<16x128xf32>
    %155 = arith.addf %152, %154 : vector<16x128xf32>
    %156 = vector.extract_strided_slice %155 {offsets = [0, 0], sizes = [16, 8], strides = [1, 1]} : vector<16x128xf32> to vector<16x8xf32>
    %c0_68 = arith.constant 0 : index
    %c0_69 = arith.constant 0 : index
    %c0_70 = arith.constant 0 : index
    %157 = vector.load %arg17[%c0_68, %c0_69, %c0_70] : memref<1x16x8xf32, #tpu.memory_space<vmem>>, vector<1x16x8xf32>
    %158 = vector.shape_cast %157 : vector<1x16x8xf32> to vector<16x8xf32>
    %159 = vector.shape_cast %156 : vector<16x8xf32> to vector<1x16x8xf32>
    tpu.vector_store %arg17[%c0_68, %c0_69, %c0_70], %159 {strides = array<i32>} : memref<1x16x8xf32, #tpu.memory_space<vmem>>, vector<1x16x8xf32>,
    return
  }
  func.func @transform_0(%arg0: i32, %arg1: i32) -> (i32, i32, i32) {
    %c0_i32 = arith.constant 0 : i32
    %c0_i32_0 = arith.constant 0 : i32
    return %arg0, %arg1, %c0_i32 : i32, i32, i32
  }
  func.func @transform_1(%arg0: i32, %arg1: i32) -> (i32, i32, i32) {
    %c0_i32 = arith.constant 0 : i32
    %c0_i32_0 = arith.constant 0 : i32
    %c0_i32_1 = arith.constant 0 : i32
    return %arg0, %c0_i32, %c0_i32_0 : i32, i32, i32
  }
  func.func @transform_2(%arg0: i32, %arg1: i32) -> (i32, i32, i32) {
    %c0_i32 = arith.constant 0 : i32
    %c0_i32_0 = arith.constant 0 : i32
    %c0_i32_1 = arith.constant 0 : i32
    return %arg0, %c0_i32, %c0_i32_0 : i32, i32, i32
  }
  func.func @transform_3(%arg0: i32, %arg1: i32) -> (i32, i32) {
    %c0_i32 = arith.constant 0 : i32
    %c0_i32_0 = arith.constant 0 : i32
    %c0_i32_1 = arith.constant 0 : i32
    return %c0_i32, %c0_i32_0 : i32, i32
  }
  func.func @transform_4(%arg0: i32, %arg1: i32) -> (i32, i32) {
    %c0_i32 = arith.constant 0 : i32
    %c0_i32_0 = arith.constant 0 : i32
    %c0_i32_1 = arith.constant 0 : i32
    return %c0_i32, %c0_i32_0 : i32, i32
  }
  func.func @transform_5(%arg0: i32, %arg1: i32) -> (i32, i32) {
    %c0_i32 = arith.constant 0 : i32
    %c0_i32_0 = arith.constant 0 : i32
    %c0_i32_1 = arith.constant 0 : i32
    return %c0_i32, %c0_i32_0 : i32, i32
  }
  func.func @transform_6(%arg0: i32, %arg1: i32) -> (i32, i32) {
    %c0_i32 = arith.constant 0 : i32
    %c0_i32_0 = arith.constant 0 : i32
    %c0_i32_1 = arith.constant 0 : i32
    return %c0_i32, %c0_i32_0 : i32, i32
  }
  func.func @transform_7(%arg0: i32, %arg1: i32) -> (i32, i32) {
    %c0_i32 = arith.constant 0 : i32
    %c0_i32_0 = arith.constant 0 : i32
    %c0_i32_1 = arith.constant 0 : i32
    return %c0_i32, %c0_i32_0 : i32, i32
  }
  func.func @transform_8(%arg0: i32, %arg1: i32) -> (i32, i32) {
    %c0_i32 = arith.constant 0 : i32
    %c0_i32_0 = arith.constant 0 : i32
    %c0_i32_1 = arith.constant 0 : i32
    return %c0_i32, %c0_i32_0 : i32, i32
  }
  func.func @transform_9(%arg0: i32, %arg1: i32) -> (i32, i32) {
    %c0_i32 = arith.constant 0 : i32
    %c0_i32_0 = arith.constant 0 : i32
    %c0_i32_1 = arith.constant 0 : i32
    return %c0_i32, %c0_i32_0 : i32, i32
  }
  func.func @transform_10(%arg0: i32, %arg1: i32) -> (i32, i32) {
    %c0_i32 = arith.constant 0 : i32
    %c0_i32_0 = arith.constant 0 : i32
    %c0_i32_1 = arith.constant 0 : i32
    return %c0_i32, %c0_i32_0 : i32, i32
  }
  func.func @transform_11(%arg0: i32, %arg1: i32) -> (i32, i32) {
    %c0_i32 = arith.constant 0 : i32
    %c0_i32_0 = arith.constant 0 : i32
    %c0_i32_1 = arith.constant 0 : i32
    return %c0_i32, %c0_i32_0 : i32, i32
  }
  func.func @transform_12(%arg0: i32, %arg1: i32) -> (i32, i32) {
    %c0_i32 = arith.constant 0 : i32
    %c0_i32_0 = arith.constant 0 : i32
    %c0_i32_1 = arith.constant 0 : i32
    return %c0_i32, %c0_i32_0 : i32, i32
  }
  func.func @transform_13(%arg0: i32, %arg1: i32) -> (i32, i32) {
    %c0_i32 = arith.constant 0 : i32
    %c0_i32_0 = arith.constant 0 : i32
    %c0_i32_1 = arith.constant 0 : i32
    return %c0_i32, %c0_i32_0 : i32, i32
  }
  func.func @transform_14(%arg0: i32, %arg1: i32) -> (i32, i32) {
    %c0_i32 = arith.constant 0 : i32
    %c0_i32_0 = arith.constant 0 : i32
    %c0_i32_1 = arith.constant 0 : i32
    return %c0_i32, %c0_i32_0 : i32, i32
  }
  func.func @transform_15(%arg0: i32, %arg1: i32) -> (i32, i32, i32) {
    %c0_i32 = arith.constant 0 : i32
    %c0_i32_0 = arith.constant 0 : i32
    return %arg0, %arg1, %c0_i32 : i32, i32, i32
  }
}

module attributes {stable_mosaic.version = 11 : i64} {
  func.func @kernel(%arg0: i32, %arg1: i32, %arg2: memref<1x16x2xf32, #tpu.memory_space<vmem>>, %arg3: memref<1x256x8xbf16, #tpu.memory_space<vmem>>, %arg4: memref<1x1x128xf32, #tpu.memory_space<vmem>>, %arg5: memref<2x128xf32, #tpu.memory_space<vmem>>, %arg6: memref<8x128xbf16, #tpu.memory_space<vmem>>, %arg7: memref<128x128xbf16, #tpu.memory_space<vmem>>, %arg8: memref<1x128xf32, #tpu.memory_space<vmem>>, %arg9: memref<128x128xbf16, #tpu.memory_space<vmem>>, %arg10: memref<1x128xf32, #tpu.memory_space<vmem>>, %arg11: memref<128x128xbf16, #tpu.memory_space<vmem>>, %arg12: memref<1x128xf32, #tpu.memory_space<vmem>>, %arg13: memref<128x128xbf16, #tpu.memory_space<vmem>>, %arg14: memref<1x128xf32, #tpu.memory_space<vmem>>, %arg15: memref<128x128xbf16, #tpu.memory_space<vmem>>, %arg16: memref<1x128xf32, #tpu.memory_space<vmem>>, %arg17: memref<1x16x8xf32, #tpu.memory_space<vmem>>) attributes {dimension_semantics = [#tpu.dimension_semantics<parallel>, #tpu.dimension_semantics<parallel>], iteration_bounds = array<i64: 2, 2>, scalar_prefetch = 0 : i64, scratch_operands = 0 : i64, tpu.core_type = #tpu.core_type<tc>, window_params = [{transform_indices = @transform_0, window_bounds = array<i64: 1, 16, 2>}, {transform_indices = @transform_1, window_bounds = array<i64: 1, 256, 8>}, {transform_indices = @transform_2, window_bounds = array<i64: 1, 1, 128>}, {pipeline_mode = #tpu.pipeline_mode<synchronous>, transform_indices = @transform_3, window_bounds = array<i64: 2, 128>}, {pipeline_mode = #tpu.pipeline_mode<synchronous>, transform_indices = @transform_4, window_bounds = array<i64: 8, 128>}, {pipeline_mode = #tpu.pipeline_mode<synchronous>, transform_indices = @transform_5, window_bounds = array<i64: 128, 128>}, {pipeline_mode = #tpu.pipeline_mode<synchronous>, transform_indices = @transform_6, window_bounds = array<i64: 1, 128>}, {pipeline_mode = #tpu.pipeline_mode<synchronous>, transform_indices = @transform_7, window_bounds = array<i64: 128, 128>}, {pipeline_mode = #tpu.pipeline_mode<synchronous>, transform_indices = @transform_8, window_bounds = array<i64: 1, 128>}, {pipeline_mode = #tpu.pipeline_mode<synchronous>, transform_indices = @transform_9, window_bounds = array<i64: 128, 128>}, {pipeline_mode = #tpu.pipeline_mode<synchronous>, transform_indices = @transform_10, window_bounds = array<i64: 1, 128>}, {pipeline_mode = #tpu.pipeline_mode<synchronous>, transform_indices = @transform_11, window_bounds = array<i64: 128, 128>}, {pipeline_mode = #tpu.pipeline_mode<synchronous>, transform_indices = @transform_12, window_bounds = array<i64: 1, 128>}, {pipeline_mode = #tpu.pipeline_mode<synchronous>, transform_indices = @transform_13, window_bounds = array<i64: 128, 128>}, {pipeline_mode = #tpu.pipeline_mode<synchronous>, transform_indices = @transform_14, window_bounds = array<i64: 1, 128>}, {transform_indices = @transform_15, window_bounds = array<i64: 1, 16, 8>}]} {
    %c0 = arith.constant 0 : index
    %c0_0 = arith.constant 0 : index
    %c0_1 = arith.constant 0 : index
    %0 = vector.load %arg2[%c0, %c0_0, %c0_1] : memref<1x16x2xf32, #tpu.memory_space<vmem>>, vector<1x16x2xf32>
    %1 = vector.shape_cast %0 : vector<1x16x2xf32> to vector<16x2xf32>
    %2 = vector.extract_strided_slice %1 {offsets = [0, 0], sizes = [16, 1], strides = [1, 1]} : vector<16x2xf32> to vector<16x1xf32>
    %cst = arith.constant 1.000000e+00 : f32
    %3 = vector.broadcast %cst : f32 to vector<16x1xf32>
    %4 = arith.addf %2, %3 : vector<16x1xf32>
    %cst_2 = arith.constant 7.500000e+00 : f32
    %5 = vector.broadcast %cst_2 : f32 to vector<16x1xf32>
    %6 = arith.mulf %4, %5 : vector<16x1xf32>
    %7 = vector.extract_strided_slice %1 {offsets = [0, 1], sizes = [16, 1], strides = [1, 1]} : vector<16x2xf32> to vector<16x1xf32>
    %cst_3 = arith.constant 1.000000e+00 : f32
    %8 = vector.broadcast %cst_3 : f32 to vector<16x1xf32>
    %9 = arith.addf %7, %8 : vector<16x1xf32>
    %cst_4 = arith.constant 7.500000e+00 : f32
    %10 = vector.broadcast %cst_4 : f32 to vector<16x1xf32>
    %11 = arith.mulf %9, %10 : vector<16x1xf32>
    %12 = math.floor %6 : vector<16x1xf32>
    %13 = math.floor %11 : vector<16x1xf32>
    %14 = arith.subf %6, %12 : vector<16x1xf32>
    %15 = arith.subf %11, %13 : vector<16x1xf32>
    %cst_5 = arith.constant 0.000000e+00 : f32
    %cst_6 = arith.constant 1.500000e+01 : f32
    %16 = vector.broadcast %cst_5 : f32 to vector<16x1xf32>
    %17 = arith.maximumf %16, %12 : vector<16x1xf32>
    %18 = vector.broadcast %cst_6 : f32 to vector<16x1xf32>
    %19 = arith.minimumf %18, %17 : vector<16x1xf32>
    %20 = arith.fptosi %19 : vector<16x1xf32> to vector<16x1xi32>
    %cst_7 = arith.constant 1.000000e+00 : f32
    %21 = vector.broadcast %cst_7 : f32 to vector<16x1xf32>
    %22 = arith.addf %12, %21 : vector<16x1xf32>
    %cst_8 = arith.constant 0.000000e+00 : f32
    %cst_9 = arith.constant 1.500000e+01 : f32
    %23 = vector.broadcast %cst_8 : f32 to vector<16x1xf32>
    %24 = arith.maximumf %23, %22 : vector<16x1xf32>
    %25 = vector.broadcast %cst_9 : f32 to vector<16x1xf32>
    %26 = arith.minimumf %25, %24 : vector<16x1xf32>
    %27 = arith.fptosi %26 : vector<16x1xf32> to vector<16x1xi32>
    %cst_10 = arith.constant 0.000000e+00 : f32
    %cst_11 = arith.constant 1.500000e+01 : f32
    %28 = vector.broadcast %cst_10 : f32 to vector<16x1xf32>
    %29 = arith.maximumf %28, %13 : vector<16x1xf32>
    %30 = vector.broadcast %cst_11 : f32 to vector<16x1xf32>
    %31 = arith.minimumf %30, %29 : vector<16x1xf32>
    %32 = arith.fptosi %31 : vector<16x1xf32> to vector<16x1xi32>
    %cst_12 = arith.constant 1.000000e+00 : f32
    %33 = vector.broadcast %cst_12 : f32 to vector<16x1xf32>
    %34 = arith.addf %13, %33 : vector<16x1xf32>
    %cst_13 = arith.constant 0.000000e+00 : f32
    %cst_14 = arith.constant 1.500000e+01 : f32
    %35 = vector.broadcast %cst_13 : f32 to vector<16x1xf32>
    %36 = arith.maximumf %35, %34 : vector<16x1xf32>
    %37 = vector.broadcast %cst_14 : f32 to vector<16x1xf32>
    %38 = arith.minimumf %37, %36 : vector<16x1xf32>
    %39 = arith.fptosi %38 : vector<16x1xf32> to vector<16x1xi32>
    %40 = tpu.iota {dimensions = array<i32: 1>} : vector<16x256xi32>
    %c16_i32 = arith.constant 16 : i32
    %41 = vector.broadcast %c16_i32 : i32 to vector<16x1xi32>
    %42 = arith.muli %32, %41 : vector<16x1xi32>
    %43 = arith.addi %42, %20 : vector<16x1xi32>
    %44 = vector.broadcast %43 : vector<16x1xi32> to vector<16x256xi32>
    %45 = arith.cmpi eq, %40, %44 : vector<16x256xi32>
    %cst_15 = arith.constant 1.000000e+00 : f32
    %46 = vector.broadcast %cst_15 : f32 to vector<16x1xf32>
    %47 = arith.subf %46, %14 : vector<16x1xf32>
    %cst_16 = arith.constant 1.000000e+00 : f32
    %48 = vector.broadcast %cst_16 : f32 to vector<16x1xf32>
    %49 = arith.subf %48, %15 : vector<16x1xf32>
    %50 = arith.mulf %47, %49 : vector<16x1xf32>
    %cst_17 = arith.constant 0.000000e+00 : f32
    %51 = vector.shape_cast %50 : vector<16x1xf32> to vector<16x1xf32>
    %52 = vector.broadcast %51 : vector<16x1xf32> to vector<16x256xf32>
    %53 = vector.broadcast %cst_17 : f32 to vector<16x256xf32>
    %54 = arith.select %45, %52, %53 : vector<16x256xi1>, vector<16x256xf32>
    %c16_i32_18 = arith.constant 16 : i32
    %55 = vector.broadcast %c16_i32_18 : i32 to vector<16x1xi32>
    %56 = arith.muli %32, %55 : vector<16x1xi32>
    %57 = arith.addi %56, %27 : vector<16x1xi32>
    %58 = vector.broadcast %57 : vector<16x1xi32> to vector<16x256xi32>
    %59 = arith.cmpi eq, %40, %58 : vector<16x256xi32>
    %cst_19 = arith.constant 1.000000e+00 : f32
    %60 = vector.broadcast %cst_19 : f32 to vector<16x1xf32>
    %61 = arith.subf %60, %15 : vector<16x1xf32>
    %62 = arith.mulf %14, %61 : vector<16x1xf32>
    %cst_20 = arith.constant 0.000000e+00 : f32
    %63 = vector.shape_cast %62 : vector<16x1xf32> to vector<16x1xf32>
    %64 = vector.broadcast %63 : vector<16x1xf32> to vector<16x256xf32>
    %65 = vector.broadcast %cst_20 : f32 to vector<16x256xf32>
    %66 = arith.select %59, %64, %65 : vector<16x256xi1>, vector<16x256xf32>
    %67 = arith.addf %54, %66 : vector<16x256xf32>
    %c16_i32_21 = arith.constant 16 : i32
    %68 = vector.broadcast %c16_i32_21 : i32 to vector<16x1xi32>
    %69 = arith.muli %39, %68 : vector<16x1xi32>
    %70 = arith.addi %69, %20 : vector<16x1xi32>
    %71 = vector.broadcast %70 : vector<16x1xi32> to vector<16x256xi32>
    %72 = arith.cmpi eq, %40, %71 : vector<16x256xi32>
    %cst_22 = arith.constant 1.000000e+00 : f32
    %73 = vector.broadcast %cst_22 : f32 to vector<16x1xf32>
    %74 = arith.subf %73, %14 : vector<16x1xf32>
    %75 = arith.mulf %74, %15 : vector<16x1xf32>
    %cst_23 = arith.constant 0.000000e+00 : f32
    %76 = vector.shape_cast %75 : vector<16x1xf32> to vector<16x1xf32>
    %77 = vector.broadcast %76 : vector<16x1xf32> to vector<16x256xf32>
    %78 = vector.broadcast %cst_23 : f32 to vector<16x256xf32>
    %79 = arith.select %72, %77, %78 : vector<16x256xi1>, vector<16x256xf32>
    %80 = arith.addf %67, %79 : vector<16x256xf32>
    %c16_i32_24 = arith.constant 16 : i32
    %81 = vector.broadcast %c16_i32_24 : i32 to vector<16x1xi32>
    %82 = arith.muli %39, %81 : vector<16x1xi32>
    %83 = arith.addi %82, %27 : vector<16x1xi32>
    %84 = vector.broadcast %83 : vector<16x1xi32> to vector<16x256xi32>
    %85 = arith.cmpi eq, %40, %84 : vector<16x256xi32>
    %86 = arith.mulf %14, %15 : vector<16x1xf32>
    %cst_25 = arith.constant 0.000000e+00 : f32
    %87 = vector.shape_cast %86 : vector<16x1xf32> to vector<16x1xf32>
    %88 = vector.broadcast %87 : vector<16x1xf32> to vector<16x256xf32>
    %89 = vector.broadcast %cst_25 : f32 to vector<16x256xf32>
    %90 = arith.select %85, %88, %89 : vector<16x256xi1>, vector<16x256xf32>
    %91 = arith.addf %80, %90 : vector<16x256xf32>
    %92 = arith.truncf %91 : vector<16x256xf32> to vector<16x256xbf16>
    %c0_26 = arith.constant 0 : index
    %c0_27 = arith.constant 0 : index
    %c0_28 = arith.constant 0 : index
    %93 = vector.load %arg3[%c0_26, %c0_27, %c0_28] : memref<1x256x8xbf16, #tpu.memory_space<vmem>>, vector<1x256x8xbf16>
    %94 = vector.shape_cast %93 : vector<1x256x8xbf16> to vector<256x8xbf16>
    %cst_29 = arith.constant dense<0.000000e+00> : vector<16x8xf32>
    %95 = tpu.matmul %92, %94, %cst_29 {dimension_numbers = #tpu.dot_dimension_numbers<[1], [0], [0], [1], [0, 0, 1, 1], [], []>} : vector<16x256xbf16>, vector<256x8xbf16>, vector<16x8xf32> -> vector<16x8xf32>
    %96 = arith.truncf %95 : vector<16x8xf32> to vector<16x8xbf16>
    %c0_30 = arith.constant 0 : index
    %c0_31 = arith.constant 0 : index
    %97 = vector.load %arg6[%c0_30, %c0_31] : memref<8x128xbf16, #tpu.memory_space<vmem>>, vector<8x128xbf16>
    %cst_32 = arith.constant dense<0.000000e+00> : vector<16x128xf32>
    %98 = tpu.matmul %96, %97, %cst_32 {dimension_numbers = #tpu.dot_dimension_numbers<[1], [0], [0], [1], [0, 0, 1, 1], [], []>} : vector<16x8xbf16>, vector<8x128xbf16>, vector<16x128xf32> -> vector<16x128xf32>
    %c0_33 = arith.constant 0 : index
    %c0_34 = arith.constant 0 : index
    %c0_35 = arith.constant 0 : index
    %99 = vector.load %arg4[%c0_33, %c0_34, %c0_35] : memref<1x1x128xf32, #tpu.memory_space<vmem>>, vector<1x1x128xf32>
    %100 = vector.shape_cast %99 : vector<1x1x128xf32> to vector<1x128xf32>
    %101 = vector.broadcast %100 : vector<1x128xf32> to vector<16x128xf32>
    %102 = arith.addf %98, %101 : vector<16x128xf32>
    %c0_36 = arith.constant 0 : index
    %c0_37 = arith.constant 0 : index
    %103 = vector.load %arg5[%c0_36, %c0_37] : memref<2x128xf32, #tpu.memory_space<vmem>>, vector<2x128xf32>
    %104 = vector.extract_strided_slice %1 {offsets = [0, 0], sizes = [16, 1], strides = [1, 1]} : vector<16x2xf32> to vector<16x1xf32>
    %105 = vector.extract_strided_slice %103 {offsets = [0, 0], sizes = [1, 128], strides = [1, 1]} : vector<2x128xf32> to vector<1x128xf32>
    %106 = vector.broadcast %104 : vector<16x1xf32> to vector<16x128xf32>
    %107 = vector.broadcast %105 : vector<1x128xf32> to vector<16x128xf32>
    %108 = arith.mulf %106, %107 : vector<16x128xf32>
    %109 = arith.addf %102, %108 : vector<16x128xf32>
    %110 = vector.extract_strided_slice %1 {offsets = [0, 1], sizes = [16, 1], strides = [1, 1]} : vector<16x2xf32> to vector<16x1xf32>
    %111 = vector.extract_strided_slice %103 {offsets = [1, 0], sizes = [1, 128], strides = [1, 1]} : vector<2x128xf32> to vector<1x128xf32>
    %112 = vector.broadcast %110 : vector<16x1xf32> to vector<16x128xf32>
    %113 = vector.broadcast %111 : vector<1x128xf32> to vector<16x128xf32>
    %114 = arith.mulf %112, %113 : vector<16x128xf32>
    %115 = arith.addf %109, %114 : vector<16x128xf32>
    %cst_38 = arith.constant 0.000000e+00 : f32
    %116 = vector.broadcast %cst_38 : f32 to vector<16x128xf32>
    %117 = arith.maximumf %115, %116 : vector<16x128xf32>
    %118 = arith.truncf %117 : vector<16x128xf32> to vector<16x128xbf16>
    %c0_39 = arith.constant 0 : index
    %c0_40 = arith.constant 0 : index
    %119 = vector.load %arg7[%c0_39, %c0_40] : memref<128x128xbf16, #tpu.memory_space<vmem>>, vector<128x128xbf16>
    %cst_41 = arith.constant dense<0.000000e+00> : vector<16x128xf32>
    %120 = tpu.matmul %118, %119, %cst_41 {dimension_numbers = #tpu.dot_dimension_numbers<[1], [0], [0], [1], [0, 0, 1, 1], [], []>} : vector<16x128xbf16>, vector<128x128xbf16>, vector<16x128xf32> -> vector<16x128xf32>
    %c0_42 = arith.constant 0 : index
    %c0_43 = arith.constant 0 : index
    %121 = vector.load %arg8[%c0_42, %c0_43] : memref<1x128xf32, #tpu.memory_space<vmem>>, vector<1x128xf32>
    %122 = vector.broadcast %121 : vector<1x128xf32> to vector<16x128xf32>
    %123 = arith.addf %120, %122 : vector<16x128xf32>
    %cst_44 = arith.constant 0.000000e+00 : f32
    %124 = vector.broadcast %cst_44 : f32 to vector<16x128xf32>
    %125 = arith.maximumf %123, %124 : vector<16x128xf32>
    %126 = arith.truncf %125 : vector<16x128xf32> to vector<16x128xbf16>
    %c0_45 = arith.constant 0 : index
    %c0_46 = arith.constant 0 : index
    %127 = vector.load %arg9[%c0_45, %c0_46] : memref<128x128xbf16, #tpu.memory_space<vmem>>, vector<128x128xbf16>
    %cst_47 = arith.constant dense<0.000000e+00> : vector<16x128xf32>
    %128 = tpu.matmul %126, %127, %cst_47 {dimension_numbers = #tpu.dot_dimension_numbers<[1], [0], [0], [1], [0, 0, 1, 1], [], []>} : vector<16x128xbf16>, vector<128x128xbf16>, vector<16x128xf32> -> vector<16x128xf32>
    %c0_48 = arith.constant 0 : index
    %c0_49 = arith.constant 0 : index
    %129 = vector.load %arg10[%c0_48, %c0_49] : memref<1x128xf32, #tpu.memory_space<vmem>>, vector<1x128xf32>
    %130 = vector.broadcast %129 : vector<1x128xf32> to vector<16x128xf32>
    %131 = arith.addf %128, %130 : vector<16x128xf32>
    %cst_50 = arith.constant 0.000000e+00 : f32
    %132 = vector.broadcast %cst_50 : f32 to vector<16x128xf32>
    %133 = arith.maximumf %131, %132 : vector<16x128xf32>
    %134 = arith.truncf %133 : vector<16x128xf32> to vector<16x128xbf16>
    %c0_51 = arith.constant 0 : index
    %c0_52 = arith.constant 0 : index
    %135 = vector.load %arg11[%c0_51, %c0_52] : memref<128x128xbf16, #tpu.memory_space<vmem>>, vector<128x128xbf16>
    %cst_53 = arith.constant dense<0.000000e+00> : vector<16x128xf32>
    %136 = tpu.matmul %134, %135, %cst_53 {dimension_numbers = #tpu.dot_dimension_numbers<[1], [0], [0], [1], [0, 0, 1, 1], [], []>} : vector<16x128xbf16>, vector<128x128xbf16>, vector<16x128xf32> -> vector<16x128xf32>
    %c0_54 = arith.constant 0 : index
    %c0_55 = arith.constant 0 : index
    %137 = vector.load %arg12[%c0_54, %c0_55] : memref<1x128xf32, #tpu.memory_space<vmem>>, vector<1x128xf32>
    %138 = vector.broadcast %137 : vector<1x128xf32> to vector<16x128xf32>
    %139 = arith.addf %136, %138 : vector<16x128xf32>
    %cst_56 = arith.constant 0.000000e+00 : f32
    %140 = vector.broadcast %cst_56 : f32 to vector<16x128xf32>
    %141 = arith.maximumf %139, %140 : vector<16x128xf32>
    %142 = arith.truncf %141 : vector<16x128xf32> to vector<16x128xbf16>
    %c0_57 = arith.constant 0 : index
    %c0_58 = arith.constant 0 : index
    %143 = vector.load %arg13[%c0_57, %c0_58] : memref<128x128xbf16, #tpu.memory_space<vmem>>, vector<128x128xbf16>
    %cst_59 = arith.constant dense<0.000000e+00> : vector<16x128xf32>
    %144 = tpu.matmul %142, %143, %cst_59 {dimension_numbers = #tpu.dot_dimension_numbers<[1], [0], [0], [1], [0, 0, 1, 1], [], []>} : vector<16x128xbf16>, vector<128x128xbf16>, vector<16x128xf32> -> vector<16x128xf32>
    %c0_60 = arith.constant 0 : index
    %c0_61 = arith.constant 0 : index
    %145 = vector.load %arg14[%c0_60, %c0_61] : memref<1x128xf32, #tpu.memory_space<vmem>>, vector<1x128xf32>
    %146 = vector.broadcast %145 : vector<1x128xf32> to vector<16x128xf32>
    %147 = arith.addf %144, %146 : vector<16x128xf32>
    %cst_62 = arith.constant 0.000000e+00 : f32
    %148 = vector.broadcast %cst_62 : f32 to vector<16x128xf32>
    %149 = arith.maximumf %147, %148 : vector<16x128xf32>
    %150 = arith.truncf %149 : vector<16x128xf32> to vector<16x128xbf16>
    %c0_63 = arith.constant 0 : index
    %c0_64 = arith.constant 0 : index
    %151 = vector.load %arg15[%c0_63, %c0_64] : memref<128x128xbf16, #tpu.memory_space<vmem>>, vector<128x128xbf16>
    %cst_65 = arith.constant dense<0.000000e+00> : vector<16x128xf32>
    %152 = tpu.matmul %150, %151, %cst_65 {dimension_numbers = #tpu.dot_dimension_numbers<[1], [0], [0], [1], [0, 0, 1, 1], [], []>} : vector<16x128xbf16>, vector<128x128xbf16>, vector<16x128xf32> -> vector<16x128xf32>
    %c0_66 = arith.constant 0 : index
    %c0_67 = arith.constant 0 : index
    %153 = vector.load %arg16[%c0_66, %c0_67] : memref<1x128xf32, #tpu.memory_space<vmem>>, vector<1x128xf32>
    %154 = vector.broadcast %153 : vector<1x128xf32> to vector<16x128xf32>
    %155 = arith.addf %152, %154 : vector<16x128xf32>
    %156 = vector.extract_strided_slice %155 {offsets = [0, 0], sizes = [16, 8], strides = [1, 1]} : vector<16x128xf32> to vector<16x8xf32>
    %c0_68 = arith.constant 0 : index
    %c0_69 = arith.constant 0 : index
    %c0_70 = arith.constant 0 : index
    %157 = vector.load %arg17[%c0_68, %c0_69, %c0_70] : memref<1x16x8xf32, #tpu.memory_space<vmem>>, vector<1x16x8xf32>
    %158 = vector.shape_cast %157 : vector<1x16x8xf32> to vector<16x8xf32>
    %159 = vector.shape_cast %156 : vector<16x8xf32> to vector<1x16x8xf32>
    tpu.vector_store %arg17[%c0_68, %c0_69, %c0_70], %159 {strides = array<i32>} : memref<1x16x8xf32, #tpu.memory_space<vmem>>, vector<1x16x8xf32>,
    return
  }
  func.func @transform_0(%arg0: i32, %arg1: i32) -> (i32, i32, i32) {
    %c0_i32 = arith.constant 0 : i32
    %c0_i32_0 = arith.constant 0 : i32
    return %arg0, %arg1, %c0_i32 : i32, i32, i32
  }
  func.func @transform_1(%arg0: i32, %arg1: i32) -> (i32, i32, i32) {
    %c0_i32 = arith.constant 0 : i32
    %c0_i32_0 = arith.constant 0 : i32
    %c0_i32_1 = arith.constant 0 : i32
    return %arg0, %c0_i32, %c0_i32_0 : i32, i32, i32
  }
  func.func @transform_2(%arg0: i32, %arg1: i32) -> (i32, i32, i32) {
    %c0_i32 = arith.constant 0 : i32
    %c0_i32_0 = arith.constant 0 : i32
    %c0_i32_1 = arith.constant 0 : i32
    return %arg0, %c0_i32, %c0_i32_0 : i32, i32, i32
  }
  func.func @transform_3(%arg0: i32, %arg1: i32) -> (i32, i32) {
    %c0_i32 = arith.constant 0 : i32
    %c0_i32_0 = arith.constant 0 : i32
    %c0_i32_1 = arith.constant 0 : i32
    return %c0_i32, %c0_i32_0 : i32, i32
  }
  func.func @transform_4(%arg0: i32, %arg1: i32) -> (i32, i32) {
    %c0_i32 = arith.constant 0 : i32
    %c0_i32_0 = arith.constant 0 : i32
    %c0_i32_1 = arith.constant 0 : i32
    return %c0_i32, %c0_i32_0 : i32, i32
  }
  func.func @transform_5(%arg0: i32, %arg1: i32) -> (i32, i32) {
    %c0_i32 = arith.constant 0 : i32
    %c0_i32_0 = arith.constant 0 : i32
    %c0_i32_1 = arith.constant 0 : i32
    return %c0_i32, %c0_i32_0 : i32, i32
  }
  func.func @transform_6(%arg0: i32, %arg1: i32) -> (i32, i32) {
    %c0_i32 = arith.constant 0 : i32
    %c0_i32_0 = arith.constant 0 : i32
    %c0_i32_1 = arith.constant 0 : i32
    return %c0_i32, %c0_i32_0 : i32, i32
  }
  func.func @transform_7(%arg0: i32, %arg1: i32) -> (i32, i32) {
    %c0_i32 = arith.constant 0 : i32
    %c0_i32_0 = arith.constant 0 : i32
    %c0_i32_1 = arith.constant 0 : i32
    return %c0_i32, %c0_i32_0 : i32, i32
  }
  func.func @transform_8(%arg0: i32, %arg1: i32) -> (i32, i32) {
    %c0_i32 = arith.constant 0 : i32
    %c0_i32_0 = arith.constant 0 : i32
    %c0_i32_1 = arith.constant 0 : i32
    return %c0_i32, %c0_i32_0 : i32, i32
  }
  func.func @transform_9(%arg0: i32, %arg1: i32) -> (i32, i32) {
    %c0_i32 = arith.constant 0 : i32
    %c0_i32_0 = arith.constant 0 : i32
    %c0_i32_1 = arith.constant 0 : i32
    return %c0_i32, %c0_i32_0 : i32, i32
  }
  func.func @transform_10(%arg0: i32, %arg1: i32) -> (i32, i32) {
    %c0_i32 = arith.constant 0 : i32
    %c0_i32_0 = arith.constant 0 : i32
    %c0_i32_1 = arith.constant 0 : i32
    return %c0_i32, %c0_i32_0 : i32, i32
  }
  func.func @transform_11(%arg0: i32, %arg1: i32) -> (i32, i32) {
    %c0_i32 = arith.constant 0 : i32
    %c0_i32_0 = arith.constant 0 : i32
    %c0_i32_1 = arith.constant 0 : i32
    return %c0_i32, %c0_i32_0 : i32, i32
  }
  func.func @transform_12(%arg0: i32, %arg1: i32) -> (i32, i32) {
    %c0_i32 = arith.constant 0 : i32
    %c0_i32_0 = arith.constant 0 : i32
    %c0_i32_1 = arith.constant 0 : i32
    return %c0_i32, %c0_i32_0 : i32, i32
  }
  func.func @transform_13(%arg0: i32, %arg1: i32) -> (i32, i32) {
    %c0_i32 = arith.constant 0 : i32
    %c0_i32_0 = arith.constant 0 : i32
    %c0_i32_1 = arith.constant 0 : i32
    return %c0_i32, %c0_i32_0 : i32, i32
  }
  func.func @transform_14(%arg0: i32, %arg1: i32) -> (i32, i32) {
    %c0_i32 = arith.constant 0 : i32
    %c0_i32_0 = arith.constant 0 : i32
    %c0_i32_1 = arith.constant 0 : i32
    return %c0_i32, %c0_i32_0 : i32, i32
  }
  func.func @transform_15(%arg0: i32, %arg1: i32) -> (i32, i32, i32) {
    %c0_i32 = arith.constant 0 : i32
    %c0_i32_0 = arith.constant 0 : i32
    return %arg0, %arg1, %c0_i32 : i32, i32, i32
  }
}

</mosaic_0001>

<bundles_post_ra>
// kernel: tpu_custom_call.1
= control target key start
LH: loop header
LB: loop body
LE: loop exit
PB: predicated region body
PF: predicated region fallthrough
CT: control target
= control target key end

     0   :  { %s2200_s18 = smov 0   ;;  %s2202_s19 = smov 0   ;;  %s2528_s0 = inlined_call_operand.vmem [shape: f32[2,32,2], index: 0, kind: input, shape index: {}]   ;;  %s2529_s1 = inlined_call_operand.vmem [shape: bf16[2,256,8], index: 1, kind: input, shape index: {}]   ;;  %s2530_s2 = inlined_call_operand.vmem [shape: f32[2,1,128], index: 2, kind: input, shape index: {}]   ;;  %s2531_s3 = inlined_call_operand.vmem [shape: f32[2,128], index: 3, kind: input, shape index: {}]   ;;  %s2532_s4 = inlined_call_operand.vmem [shape: bf16[8,128], index: 4, kind: input, shape index: {}]   ;;  %s2533_s5 = inlined_call_operand.vmem [shape: bf16[128,128], index: 5, kind: input, shape index: {}]   ;;  %s2534_s6 = inlined_call_operand.vmem [shape: f32[1,128], index: 6, kind: input, shape index: {}]   ;;  %s2535_s7 = inlined_call_operand.vmem [shape: bf16[128,128], index: 7, kind: input, shape index: {}]   ;;  %s2536_s8 = inlined_call_operand.vmem [shape: f32[1,128], index: 8, kind: input, shape index: {}]   ;;  %s2537_s9 = inlined_call_operand.vmem [shape: bf16[128,128], index: 9, kind: input, shape index: {}]   ;;  %s2538_s10 = inlined_call_operand.vmem [shape: f32[1,128], index: 10, kind: input, shape index: {}]   ;;  %s2539_s11 = inlined_call_operand.vmem [shape: bf16[128,128], index: 11, kind: input, shape index: {}]   ;;  %s2540_s12 = inlined_call_operand.vmem [shape: f32[1,128], index: 12, kind: input, shape index: {}]   ;;  %s2541_s13 = inlined_call_operand.vmem [shape: bf16[128,128], index: 13, kind: input, shape index: {}]   ;;  %s2542_s14 = inlined_call_operand.vmem [shape: f32[1,128], index: 14, kind: input, shape index: {}]   ;;  %s2543_s15 = inlined_call_operand.vmem [shape: f32[2,32,8], index: 15, kind: output, shape index: {}]  }
   0x1   :  { %s2204_s20 = smov 0   ;;  %s2206_s21 = smov 0  }
   0x2   :  { %s2208_s22 = smov 0  }
   0x3 LB: > { %s34_s23 = sadd.s32 1, %s2104_s20  ;;  %s37_s24 = sadd.s32 1, %s2108_s21  ;;  %s2112_s22 = sphi %s2208_s22, %s25_s22   ;;  %s2108_s21 = sphi %s2206_s21, %s2551_s21   ;;  %s2104_s20 = sphi %s2204_s20, %s2550_s20   ;;  %s2100_s19 = sphi %s2202_s19, %s2549_s19   ;;  %s2096_s18 = sphi %s2200_s18, %s2548_s18  }
   0x4   : > { %p35_p0 = scmp.ge.s32.totalorder %s34_s23, 2  ;;  %p1706_p1 = scmp.ge.s32.totalorder %s2112_s22, 1 }
   0x5   : > { %p476_p2 = scmp.lt.s32.totalorder %s2112_s22, 5 }
   0x6   : > { %s2553_s23 = smov (%p35_p0, %s34_s23), 0  ;;  %s2555_s24 = smov (!%p35_p0, %s37_s24), %s2108_s21 }
   0x7   : > { %2544 = sst [smem:[#allocation2_spill]] %s2553_s23  ;;  %p477_p3 = pnand %p1706_p1, %p476_p2 }
   0x8   : > { %p39_p4 = scmp.ge.s32.totalorder %s2555_s24, 2  ;;  %s1707_s25 = sshll.u32 (!%p477_p3), %s2096_s18, 1  ;;  %v2115_v24 = vmov (!%p477_p3), 0   ;;  %v2117_v48 = vmov (!%p477_p3), 1  }
   0x9   : > { %480 = sbr.rel (%p477_p3) target bundleno = 1873 (0x751), region = 80  ;;  %p541_p5 = scmp.lt.s32.totalorder (!%p477_p3), %s2100_s19, 1  ;;  %2010 = vset.pattern.permute.xlu1 (!%p477_p3), %v2115_v24  ;;  %2011 = vset.pattern.permute.xlu0 (!%p477_p3), %v2115_v24 }
   0xa   : > { %s2557_s24 = smov (%p39_p4, %s2555_s24), 0  ;;  %p543_p6 = scmp.lt.s32.totalorder (!%p477_p3), %s1707_s25, 3 }
   0xb   : > { %2545 = sst [smem:[#allocation3_spill]] %s2557_s24  ;;  %s2116_s24 = smov (!%p477_p3), 1  }
  0x10   : > { %s2559_s19 = smov (!%p541_p5, %s2100_s19), 1  ;;  %s2561_s25 = smov (!%p543_p6, %s1707_s25), 3 }
  0x11   : > { %s1708_s26 = sshll.u32 %s2559_s19, 2  ;;  %s1780_s27 = sshll.u32 %s2559_s19, 7 }
  0x12   : > { %s2234_s28 = sadd.s32 %s1708_s26, %s2561_s25  ;;  %s2239_s16 = scalar_lea.vmem %s2529_s1, %s1780_s27 }
  0x13   : > { %s1709_s17 = sshll.u32 %s2234_s28, 3  ;;  %v2018_v49 = vld [vmem:[%s2239_s16 + $0x40] sm:$0xff]   ;;  %v2020_v53 = vld [vmem:[%s2239_s16 + $0x48] sm:$0xff]   ;;  %v2022_v58 = vld [vmem:[%s2239_s16 + $0x50] sm:$0xff]  }
  0x14   : > { %s548_s23 = scalar_lea.vmem %s2528_s0, %s1709_s17  ;;  %v2019_v51 = vld [vmem:[%s2239_s16] sm:$0xff]   ;;  %1781 = vmatprep.subr.bf16.mxu0 %v2018_v49  ;;  %v2021_v56 = vld [vmem:[%s2239_s16 + $0x8] sm:$0xff]   ;;  %v2023_v60 = vld [vmem:[%s2239_s16 + $0x10] sm:$0xff]   ;;  %s566_s27 = scalar_lea.vmem %s2543_s15, %s1709_s17 }
  0x15   : > { %v2247_v0 = vld [vmem:[%s548_s23] sm:$0xff]  ;;  %v2249_v1 = vld [vmem:[%s548_s23 + $0x8] sm:$0xff]  ;;  %s2114_s23 = smov 127   ;;  %1782 = vmatpush3.bf16.msra.mxu0 %v2019_v51  ;;  %v2024_v62 = vld [vmem:[%s2239_s16 + $0x58] sm:$0xff]  }
  0x16   : > { %v571_v2 = vadd.f32 1.0, %v2247_v0  ;;  %v572_v3 = vadd.f32 1.0, %v2249_v1  ;;  %1783 = vmatprep.subr.bf16.mxu0 %v2020_v53 }
  0x18   : > { %v573_v4 = vmul.f32 7.5, %v571_v2  ;;  %v574_v5 = vmul.f32 7.5, %v572_v3  ;;  %v2025_v2 = vld [vmem:[%s2239_s16 + $0x18] sm:$0xff]   ;;  %v2026_v3 = vld [vmem:[%s2239_s16 + $0x60] sm:$0xff]  }
  0x19   : > { %1784 = vmatpush3.bf16.msra.mxu0 %v2021_v56 }
  0x1a   : > { %v575_v6 = vfloor.f32 %v573_v4  ;;  %v576_v7 = vfloor.f32 %v574_v5  ;;  %1785 = vmatprep.subr.bf16.mxu0 %v2022_v58 }
  0x1c   : > { %v2253_v8 = vsub.f32 %v573_v4, %v575_v6  ;;  %v2255_v9 = vsub.f32 %v574_v5, %v576_v7  ;;  %v579_v10 = vmax.f32 %v575_v6, 0.0  ;;  %v585_v11 = vadd.f32 1.0, %v575_v6  ;;  %v2027_v5 = vld [vmem:[%s2239_s16 + $0x20] sm:$0xff]   ;;  %v2028_v6 = vld [vmem:[%s2239_s16 + $0x68] sm:$0xff]  }
  0x1d   : > { %v580_v12 = vmax.f32 %v576_v7, 0.0  ;;  %v586_v13 = vadd.f32 1.0, %v576_v7  ;;  %1786 = vmatpush3.bf16.msra.mxu0 %v2023_v60 }
  0x1e   : > { %v614_v14 = vsub.f32 1.0, %v2253_v8  ;;  %v615_v15 = vsub.f32 1.0, %v2255_v9  ;;  %v581_v16 = vmin.f32 %v579_v10, 15.0  ;;  %v587_v17 = vmax.f32 %v585_v11, 0.0  ;;  %1787 = vmatprep.subr.bf16.mxu0 %v2024_v62  ;;  %v2030_v10 = vld [vmem:[%s2239_s16 + $0x70] sm:$0xff]  }
  0x1f   : > { %v582_v18 = vmin.f32 %v580_v12, 15.0  ;;  %v588_v19 = vmax.f32 %v586_v13, 0.0  ;;  %v2031_v11 = vld [vmem:[%s2239_s16 + $0x30] sm:$0xff]   ;;  %v2032_v13 = vld [vmem:[%s2239_s16 + $0x78] sm:$0xff]   ;;  %v2118_v62 = vmov 0.0  }
  0x20   : > { %618 = vrot.lane.b32.xlu0 %v614_v14, %s2114_s23  ;;  %620 = vrot.lane.b32.xlu1 %v615_v15, %s2114_s23  ;;  %v1956_v20 = vtrunc.f32 %v581_v16  ;;  %v589_v21 = vmin.f32 %v587_v17, 15.0 }
  0x21   : > { %v1958_v22 = vtrunc.f32 %v582_v18  ;;  %v590_v23 = vmin.f32 %v588_v19, 15.0  ;;  %1788 = vmatpush3.bf16.msra.mxu0 %v2025_v2  ;;  %1850 = vmatprep.subr.bf16.mxu1 %v2118_v62 }
  0x22   : > { %v2261_v25 = vcvt.f32.s32 %v1956_v20  ;;  %v1960_v26 = vtrunc.f32 %v589_v21  ;;  %1789 = vmatprep.subr.bf16.mxu0 %v2026_v3  ;;  %v593_v20 = vlaneseq }
  0x23   : > { %v1962_v27 = vtrunc.f32 %v590_v23  ;;  %v1959_v29 = vcvt.f32.s32 %v1958_v22 }
  0x24   : > { %598 = vrot.lane.b32.xlu0 %v2261_v25, %s2116_s24  ;;  %v2264_v28 = vcvt.f32.s32 %v1960_v26  ;;  %v596_v43 = vmul.u32 16, %v2261_v25  ;;  %v594_v22 = vand.u32 127, %v593_v20 }
  0x25   : > { %v2267_v30 = vcvt.f32.s32 %v1962_v27  ;;  %v597_v50 = vmul.u32 16, %v1959_v29  ;;  %1790 = vmatpush3.bf16.msra.mxu0 %v2027_v5 }
  0x26   : > { %640 = vrot.lane.b32.xlu1 %v2264_v28, %s2116_s24  ;;  %v676_v45 = vmul.u32 16, %v2264_v28  ;;  %1791 = vmatprep.subr.bf16.mxu0 %v2028_v6  ;;  %v595_v25 = vadd.s32 128, %v594_v22 }
  0x27   : > { %v677_v54 = vmul.u32 16, %v2267_v30 }
  0x28   : > { %600 = vrot.lane.b32.xlu0 %v1959_v29, %s2116_s24 }
  0x2a   : > { %642 = vrot.lane.b32.xlu1 %v2267_v30, %s2116_s24 }
  0x2c   : > { %692 = vrot.lane.b32.xlu0 %v2253_v8, %s2114_s23 }
  0x2e   : > { %694 = vrot.lane.b32.xlu1 %v2255_v9, %s2114_s23  ;;  %s557_s23 = scalar_lea.vmem %s2530_s2, %s2559_s19 }
  0x92   : > { %v619_v31 = vpop.permute.xlu0 %618  ;;  %v621_v32 = vpop.permute.xlu1 %620 }
  0x93   : > { %v624_v41 = vmul.f32 %v619_v31, %v614_v14  ;;  %v625_v42 = vmul.f32 %v621_v32, %v615_v15  ;;  %v656_v44 = vmul.f32 %v619_v31, %v2253_v8  ;;  %v657_v47 = vmul.f32 %v621_v32, %v2255_v9 }
  0x96   : > { %v599_v33 = vpop.permute.xlu0 %598 }
  0x97   : > { %v602_v46 = vadd.s32 %v599_v33, %v596_v43  ;;  %v678_v52 = vadd.s32 %v676_v45, %v599_v33 }
  0x98   : > { %v641_v34 = vpop.permute.xlu1 %640 }
  0x99   : > { %v644_v63 = vadd.s32 %v641_v34, %v596_v43  ;;  %v718_v4 = vadd.s32 %v676_v45, %v641_v34 }
  0x9a   : > { %v601_v35 = vpop.permute.xlu0 %600 }
  0x9b   : > { %v603_v55 = vadd.s32 %v601_v35, %v597_v50  ;;  %v679_v59 = vadd.s32 %v677_v54, %v601_v35 }
  0x9c   : > { %v643_v36 = vpop.permute.xlu1 %642 }
  0x9d   : > { %v645_v57 = vadd.s32 %v643_v36, %v597_v50  ;;  %v719_v7 = vadd.s32 %v677_v54, %v643_v36 }
  0x9e   : > { %v693_v37 = vpop.permute.xlu0 %692 }
  0x9f   : > { %v698_v38 = vmul.f32 %v693_v37, %v614_v14  ;;  %v730_v61 = vmul.f32 %v693_v37, %v2253_v8  ;;  %v2029_v8 = vld [vmem:[%s2239_s16 + $0x28] sm:$0xff]   ;;  %v2033_v14 = vld [vmem:[%s2239_s16 + $0x38] sm:$0xff]  }
  0xa0   : > { %v2272_v39 = vpop.permute.xlu1 %694  ;;  %1792 = vmatpush3.bf16.msra.mxu0 %v2029_v8  ;;  %v2034_v8 = vld [vmem:[%s2533_s5] sm:$0xff]  }
  0xa1   : > { %v699_v40 = vmul.f32 %v2272_v39, %v615_v15  ;;  %702 = vperm.xlu1 %2010, %v698_v38   ;;  %1793 = vmatprep.subr.bf16.mxu0 %v2030_v10  ;;  %v731_v12 = vmul.f32 %v2272_v39, %v2255_v9 }
  0xa3   : > { %707 = vperm.xlu0 %2011, %v699_v40  }
  0xa4   : > { %1794 = vmatpush3.bf16.msra.mxu0 %v2031_v11  ;;  %v2035_v11 = vld [vmem:[%s2533_s5 + $0x8] sm:$0xff]  }
  0xa5   : > { %628 = vperm.xlu1 %2010, %v624_v41   ;;  %1795 = vmatprep.subr.bf16.mxu0 %v2032_v13  ;;  %v2037_v13 = vld [vmem:[%s2533_s5 + $0x18] sm:$0xff]  }
  0xa7   : > { %633 = vperm.xlu0 %2011, %v625_v42  }
  0xa8   : > { %1796 = vmatpush3.bf16.msra.mxu0 %v2033_v14  ;;  %v2038_v14 = vld [vmem:[%s2533_s5 + $0x20] sm:$0xff]  }
  0xa9   : > { %660 = vperm.xlu1 %2010, %v656_v44   ;;  %1876 = vmatprep.subr.bf16.mxu0 %v2118_v62 }
  0xab   : > { %2012 = vset.pattern.permute.xlu0 %v2117_v48 }
  0xac   : > { %605 = vperm.xlu0 %2012, %v602_v46  }
  0xad   : > { %665 = vperm.xlu1 %2010, %v657_v47  }
  0xb0   : > { %681 = vperm.xlu0 %2012, %v678_v52  }
  0xb1   : > { %2013 = vset.pattern.permute.xlu1 %v2117_v48 }
  0xb2   : > { %608 = vperm.xlu1 %2013, %v603_v55  }
  0xb4   : > { %650 = vperm.xlu0 %2012, %v645_v57  }
  0xb6   : > { %684 = vperm.xlu1 %2013, %v679_v59  }
  0xb8   : > { %2014 = vset.pattern.permute.xlu0 %v2115_v24 }
  0xb9   : > { %734 = vperm.xlu0 %2014, %v730_v61   ;;  %v922_v61 = vld [vmem:[%s2532_s4] sm:$0xf] }
  0xba   : > { %647 = vperm.xlu1 %2013, %v644_v63  }
  0xbd   : > { %982 = vperm.xlu0 %2014, %v2247_v0  }
  0xbe   : > { %721 = vperm.xlu1 %2013, %v718_v4  }
  0xc1   : > { %2016 = vset.pattern.permute.xlu0 %v2117_v48 }
  0xc2   : > { %724 = vperm.xlu1 %2013, %v719_v7   ;;  %999 = vperm.xlu0 %2016, %v2247_v0  }
  0xc6   : > { %2015 = vset.pattern.permute.xlu1 %v2115_v24 }
  0xc7   : > { %739 = vperm.xlu1 %2015, %v731_v12   ;;  %v2036_v12 = vld [vmem:[%s2533_s5 + $0x10] sm:$0xff]  }
  0xcb   : > { %987 = vperm.xlu1 %2015, %v2249_v1  }
  0xcf   : > { %2017 = vset.pattern.permute.xlu1 %v2117_v48 }
  0xd0   : > { %1003 = vperm.xlu1 %2017, %v2249_v1  }
 0x120   : > { %v703_v15 = vpop.permute.xlu1 %702 }
 0x122   : > { %v708_v16 = vpop.permute.xlu0 %707 }
 0x124   : > { %v629_v0 = vpop.permute.xlu1 %628 }
 0x126   : > { %v634_v17 = vpop.permute.xlu0 %633 }
 0x128   : > { %v661_v18 = vpop.permute.xlu1 %660 }
 0x12b   : > { %v606_v9 = vpop.permute.xlu0 %605 }
 0x12c   : > { %v666_v19 = vpop.permute.xlu1 %665  ;;  %vm610_vm2 = vcmp.eq.s32.totalorder %v594_v22, %v606_v9  ;;  %vm611_vm3 = vcmp.eq.s32.totalorder %v595_v25, %v606_v9  ;;  %v2045_v9 = vld [vmem:[%s2535_s7 + $0x18] sm:$0xff]  }
 0x12d   : > { %v636_v30 = vsel %vm610_vm2, %v629_v0, 0.0  ;;  %v637_v31 = vsel %vm611_vm3, %v629_v0, 0.0  ;;  %vm930_vm2 = vcmask 64512   ;;  %v2041_v0 = vld [vmem:[%s2533_s5 + $0x38] sm:$0xff]  }
 0x12f   : > { %v682_v23 = vpop.permute.xlu0 %681 }
 0x130   : > { %vm686_vm8 = vcmp.eq.s32.totalorder %v594_v22, %v682_v23  ;;  %vm687_vm9 = vcmp.eq.s32.totalorder %v595_v25, %v682_v23  ;;  %v991_v23 = vshrl.u32 %v593_v20, 7 }
 0x131   : > { %v609_v21 = vpop.permute.xlu1 %608  ;;  %v710_v41 = vsel %vm686_vm8, %v703_v15, 0.0  ;;  %v711_v42 = vsel %vm687_vm9, %v703_v15, 0.0  ;;  %v2039_v15 = vld [vmem:[%s2533_s5 + $0x28] sm:$0xff]  }
 0x132   : > { %vm612_vm6 = vcmp.eq.s32.totalorder %v594_v22, %v609_v21  ;;  %vm613_vm7 = vcmp.eq.s32.totalorder %v595_v25, %v609_v21  ;;  %v2046_v21 = vld [vmem:[%s2535_s7 + $0x20] sm:$0xff]  }
 0x133   : > { %v651_v26 = vpop.permute.xlu0 %650  ;;  %v638_v36 = vsel %vm612_vm6, %v634_v17, 0.0  ;;  %v639_v37 = vsel %vm613_vm7, %v634_v17, 0.0  ;;  %v2042_v17 = vld [vmem:[%s2535_s7] sm:$0xff]  }
 0x134   : > { %vm654_vm4 = vcmp.eq.s32.totalorder %v594_v22, %v651_v26  ;;  %vm655_vm5 = vcmp.eq.s32.totalorder %v595_v25, %v651_v26  ;;  %v979_v26 = vld [vmem:[%s2531_s3] sm:$0x3] }
 0x135   : > { %v685_v24 = vpop.permute.xlu1 %684  ;;  %v670_v32 = vsel %vm654_vm4, %v666_v19, 0.0  ;;  %v671_v33 = vsel %vm655_vm5, %v666_v19, 0.0  ;;  %v2044_v19 = vld [vmem:[%s2535_s7 + $0x10] sm:$0xff]  }
 0x136   : > { %vm688_vm10 = vcmp.eq.s32.totalorder %v594_v22, %v685_v24  ;;  %vm689_vm11 = vcmp.eq.s32.totalorder %v595_v25, %v685_v24  ;;  %v674_v39 = vadd.f32 %v670_v32, %v638_v36  ;;  %v675_v40 = vadd.f32 %v671_v33, %v639_v37 }
 0x137   : > { %v712_v43 = vsel %vm688_vm10, %v708_v16, 0.0  ;;  %v713_v44 = vsel %vm689_vm11, %v708_v16, 0.0  ;;  %v2040_v16 = vld [vmem:[%s2533_s5 + $0x30] sm:$0xff]   ;;  %v992_v24 = vsub.s32 0, %v991_v23 }
 0x138   : > { %v735_v45 = vpop.permute.xlu0 %734  ;;  %v716_v50 = vadd.f32 %v712_v43, %v674_v39  ;;  %v717_v51 = vadd.f32 %v713_v44, %v675_v40 }
 0x139   : > { %v648_v27 = vpop.permute.xlu1 %647 }
 0x13a   : > { %vm652_vm0 = vcmp.eq.s32.totalorder %v594_v22, %v648_v27  ;;  %vm653_vm1 = vcmp.eq.s32.totalorder %v595_v25, %v648_v27 }
 0x13b   : > { %v668_v1 = vsel %vm652_vm0, %v661_v18, 0.0  ;;  %v669_v28 = vsel %vm653_vm1, %v661_v18, 0.0  ;;  %vm934_vm0 = vcmask 1043456   ;;  %vm2119_vm1 = vmmov 0   ;;  %v2043_v18 = vld [vmem:[%s2535_s7 + $0x8] sm:$0xff]  }
 0x13c   : > { %v672_v34 = vadd.f32 %v668_v1, %v636_v30  ;;  %v673_v35 = vadd.f32 %v669_v28, %v637_v31  ;;  %v936_v63 = vsel %vm934_vm0, %v922_v61, 0  ;;  %1852 = vmatprep.mubr.msk.bf16.mxu1 %vm2119_vm1, %v2118_v62  ;;  %v983_v27 = vpop.permute.xlu0 %982  ;;  %v993_v28 = vrot.slane %v979_v26, %v992_v24  ;;  %v1731_v30 = vld [vmem:[%s557_s23] ss:$0 sm:$0xff]  ;;  %v2064_v24 = vld [vmem:[%s2539_s11 + $0x30] sm:$0xff]  }
 0x13d   : > { %v722_v29 = vpop.permute.xlu1 %721  ;;  %1851 = vmatpush3.bf16.msra.mxu1 %v936_v63 }
 0x13e   : > { %vm726_vm12 = vcmp.eq.s32.totalorder %v594_v22, %v722_v29  ;;  %vm727_vm13 = vcmp.eq.s32.totalorder %v595_v25, %v722_v29  ;;  %v714_v46 = vadd.f32 %v710_v41, %v672_v34  ;;  %v715_v47 = vadd.f32 %v711_v42, %v673_v35  ;;  %1856 = vmatprep.subr.bf16.mxu1 %v2118_v62 }
 0x13f   : > { %v742_v48 = vsel %vm726_vm12, %v735_v45, 0.0  ;;  %v743_v49 = vsel %vm727_vm13, %v735_v45, 0.0  ;;  %v994_v34 = vmul.f32 %v993_v28, %v983_v27  ;;  %v2067_v27 = vld [vmem:[%s2541_s13 + $0x8] sm:$0xff]  }
 0x140   : > { %v746_v55 = vadd.f32 %v742_v48, %v714_v46  ;;  %v747_v57 = vadd.f32 %v743_v49, %v715_v47  ;;  %v2048_v49 = vld [vmem:[%s2535_s7 + $0x30] sm:$0xff]  }
 0x141   : > { %v725_v38 = vpop.permute.xlu1 %724  ;;  %v1000_v31 = vpop.permute.xlu0 %999 }
 0x142   : > { %vm728_vm14 = vcmp.eq.s32.totalorder %v594_v22, %v725_v38  ;;  %vm729_vm15 = vcmp.eq.s32.totalorder %v595_v25, %v725_v38  ;;  %v2047_v22 = vld [vmem:[%s2535_s7 + $0x28] sm:$0xff]   ;;  %v1008_v25 = vsub.s32 1, %v991_v23 }
 0x144   : > { %v1009_v29 = vrot.slane %v979_v26, %v1008_v25  ;;  %v2065_v25 = vld [vmem:[%s2539_s11 + $0x38] sm:$0xff]   ;;  %v2066_v26 = vld [vmem:[%s2541_s13] sm:$0xff]  }
 0x146   : > { %v740_v52 = vpop.permute.xlu1 %739  ;;  %v1010_v36 = vmul.f32 %v1009_v29, %v1000_v31  ;;  %v1751_v31 = vld [vmem:[%s2538_s10] ss:$0 sm:$0xff] }
 0x147   : > { %v744_v53 = vsel %vm728_vm14, %v740_v52, 0.0  ;;  %v745_v54 = vsel %vm729_vm15, %v740_v52, 0.0  ;;  %v2051_v52 = vld [vmem:[%s2537_s9 + $0x8] sm:$0xff]  }
 0x148   : > { %v748_v56 = vadd.f32 %v744_v53, %v716_v50  ;;  %v749_v58 = vadd.f32 %v745_v54, %v717_v51  ;;  %v2049_v50 = vld [vmem:[%s2535_s7 + $0x38] sm:$0xff]   ;;  %v2050_v51 = vld [vmem:[%s2537_s9] sm:$0xff]   ;;  %v2052_v53 = vld [vmem:[%s2537_s9 + $0x10] sm:$0xff]  }
 0x149   : > { %v2053_v54 = vld [vmem:[%s2537_s9 + $0x18] sm:$0xff]  }
 0x14a   : > { %v751_v59 = vpack.c.bf16 %v749_v58, %v747_v57  ;;  %v750_v60 = vpack.c.bf16 %v748_v56, %v746_v55  ;;  %v988_v1 = vpop.permute.xlu1 %987  ;;  %v2054_v55 = vld [vmem:[%s2537_s9 + $0x20] sm:$0xff]   ;;  %v2055_v56 = vld [vmem:[%s2537_s9 + $0x28] sm:$0xff]  }
 0x14b   : > { %v995_v38 = vmul.f32 %v993_v28, %v988_v1  ;;  %v1733_v57 = vld [vmem:[%s2534_s6] ss:$0 sm:$0xff]  ;;  %v2068_v1 = vld [vmem:[%s2541_s13 + $0x10] sm:$0xff]   ;;  %v2069_v28 = vld [vmem:[%s2541_s13 + $0x18] sm:$0xff]  }
 0x14c   : > { %912 = vmatprep.mubr.bf16.mxu0 %v751_v59 }
 0x14d   : > { %913 = vmatmul.mubr.bf16.vlgmr.msra.gmra.mrb[0].mxu0 %v750_v60 }
 0x14e   : > { %1892 = vmatprep.mubr.msk.bf16.mxu0 %vm2119_vm1, %v2118_v62  ;;  %1877 = vmatpush3.bf16.msra.mxu0 %v2042_v17 }
 0x14f   : > { %1878 = vmatprep.subr.bf16.mxu0 %v2118_v62  ;;  %v1004_v33 = vpop.permute.xlu1 %1003 }
 0x150   : > { %v1011_v42 = vmul.f32 %v1009_v29, %v1004_v33  ;;  %v2070_v29 = vld [vmem:[%s2541_s13 + $0x20] sm:$0xff]  }
 0x152   : > { %1879 = vmatpush3.bf16.msra.mxu0 %v2043_v18 }
 0x153   : > { %1880 = vmatprep.subr.bf16.mxu0 %v2118_v62 }
 0x156   : > { %1881 = vmatpush3.bf16.msra.mxu0 %v2044_v19 }
 0x157   : > { %1882 = vmatprep.subr.bf16.mxu0 %v2118_v62 }
 0x15a   : > { %1883 = vmatpush3.bf16.msra.mxu0 %v2045_v9 }
 0x15b   : > { %1884 = vmatprep.subr.bf16.mxu0 %v2118_v62 }
 0x15e   : > { %1885 = vmatpush3.bf16.msra.mxu0 %v2046_v21 }
 0x15f   : > { %1886 = vmatprep.subr.bf16.mxu0 %v2118_v62 }
 0x162   : > { %1887 = vmatpush3.bf16.msra.mxu0 %v2047_v22 }
 0x163   : > { %1888 = vmatprep.subr.bf16.mxu0 %v2118_v62 }
 0x166   : > { %1889 = vmatpush3.bf16.msra.mxu0 %v2048_v49 }
 0x167   : > { %1890 = vmatprep.subr.bf16.mxu0 %v2118_v62 }
 0x16a   : > { %1891 = vmatpush3.bf16.msra.mxu0 %v2049_v50 }
 0x16b   : > { %1916 = vmatprep.subr.bf16.mxu0 %v2118_v62 }
 0x220   : > { %v1797_v2 = vpop.f32.mrb[0].mxu0 }
 0x221   : > { %v1798_v3 = vpop.f32.mrb[1].mxu0 }
 0x222   : > { %v1799_v4 = vadd.f32 %v1798_v3, %v1797_v2  ;;  %v1800_v5 = vpop.f32.mrb[2].mxu0 }
 0x223   : > { %v1801_v6 = vpop.f32.mrb[3].mxu0 }
 0x224   : > { %v1802_v7 = vadd.f32 %v1801_v6, %v1800_v5  ;;  %v2056_v6 = vld [vmem:[%s2537_s9 + $0x30] sm:$0xff]  }
 0x226   : > { %v921_v10 = vpack.c.bf16 %v1802_v7, %v1799_v4  ;;  %v2057_v7 = vld [vmem:[%s2537_s9 + $0x38] sm:$0xff]  }
 0x228   : > { %1853 = vmatmul.mubr.msk.bf16.vlgmr.msra.gmra.mrb[0].mxu1 %vm930_vm2, %v921_v10  ;;  %v2059_v10 = vld [vmem:[%s2539_s11 + $0x8] sm:$0xff]  }
 0x229   : > { %1857 = vmatpush3.bf16.msra.mxu1 %v2034_v8  ;;  %1872 = vmatprep.mubr.msk.bf16.mxu1 %vm2119_vm1, %v2118_v62  ;;  %v2058_v8 = vld [vmem:[%s2539_s11] sm:$0xff]  }
 0x22a   : > { %1858 = vmatprep.subr.bf16.mxu1 %v2118_v62 }
 0x22d   : > { %1859 = vmatpush3.bf16.msra.mxu1 %v2035_v11  ;;  %v2060_v11 = vld [vmem:[%s2539_s11 + $0x10] sm:$0xff]  }
 0x22e   : > { %1860 = vmatprep.subr.bf16.mxu1 %v2118_v62 }
 0x231   : > { %1861 = vmatpush3.bf16.msra.mxu1 %v2036_v12  ;;  %v2061_v12 = vld [vmem:[%s2539_s11 + $0x18] sm:$0xff]  }
 0x232   : > { %1862 = vmatprep.subr.bf16.mxu1 %v2118_v62 }
 0x235   : > { %1863 = vmatpush3.bf16.msra.mxu1 %v2037_v13  ;;  %v2062_v13 = vld [vmem:[%s2539_s11 + $0x20] sm:$0xff]  }
 0x236   : > { %1864 = vmatprep.subr.bf16.mxu1 %v2118_v62 }
 0x239   : > { %1865 = vmatpush3.bf16.msra.mxu1 %v2038_v14  ;;  %v2063_v14 = vld [vmem:[%s2539_s11 + $0x28] sm:$0xff]  }
 0x23a   : > { %1866 = vmatprep.subr.bf16.mxu1 %v2118_v62 }
 0x23d   : > { %1867 = vmatpush3.bf16.msra.mxu1 %v2039_v15  ;;  %v1742_v15 = vld [vmem:[%s2536_s8] ss:$0 sm:$0xff] }
 0x23e   : > { %1868 = vmatprep.subr.bf16.mxu1 %v2118_v62 }
 0x241   : > { %1869 = vmatpush3.bf16.msra.mxu1 %v2040_v16 }
 0x242   : > { %1870 = vmatprep.subr.bf16.mxu1 %v2118_v62 }
 0x245   : > { %1871 = vmatpush3.bf16.msra.mxu1 %v2041_v0 }
 0x246   : > { %1896 = vmatprep.subr.bf16.mxu1 %v2118_v62 }
 0x2fb   : > { %v972_v32 = vpop.f32.mrb[0].mxu1 }
 0x2fc   : > { %v973_v20 = vadd.f32 %v1731_v30, %v972_v32  ;;  %v1854_v35 = vpop.f32.mrb[1].mxu1 }
 0x2fd   : > { %v975_v37 = vpop.f32.mrb[2].mxu1 }
 0x2fe   : > { %v996_v39 = vadd.f32 %v994_v34, %v973_v20  ;;  %v976_v40 = vadd.f32 %v1731_v30, %v975_v37  ;;  %v1855_v41 = vpop.f32.mrb[3].mxu1  ;;  %v2071_v30 = vld [vmem:[%s2541_s13 + $0x28] sm:$0xff]  }
 0x2ff   : > { %v2073_v41 = vld [vmem:[%s2541_s13 + $0x38] sm:$0xff]  }
 0x300   : > { %v997_v43 = vadd.f32 %v995_v38, %v976_v40  ;;  %v1012_v44 = vadd.f32 %v1010_v36, %v996_v39  ;;  %v2072_v40 = vld [vmem:[%s2541_s13 + $0x30] sm:$0xff]  }
 0x302   : > { %v1013_v45 = vadd.f32 %v1011_v42, %v997_v43  ;;  %v1014_v46 = vmax.f32 %v1012_v44, 0.0  ;;  %v1760_v42 = vld [vmem:[%s2540_s12] ss:$0 sm:$0xff] }
 0x304   : > { %v1015_v47 = vmax.f32 %v1013_v45, 0.0 }
 0x306   : > { %v1016_v48 = vpack.c.bf16 %v1015_v47, %v1014_v46 }
 0x308   : > { %1873 = vmatmul.mubr.bf16.vlgmr.msra.gmra.mrb[4].mxu1 %v1016_v48 }
 0x309   : > { %1912 = vmatprep.mubr.msk.bf16.mxu1 %vm2119_vm1, %v2118_v62  ;;  %1897 = vmatpush3.bf16.msra.mxu1 %v2050_v51 }
 0x30a   : > { %1898 = vmatprep.subr.bf16.mxu1 %v2118_v62 }
 0x30d   : > { %1899 = vmatpush3.bf16.msra.mxu1 %v2051_v52 }
 0x30e   : > { %1900 = vmatprep.subr.bf16.mxu1 %v2118_v62 }
 0x311   : > { %1901 = vmatpush3.bf16.msra.mxu1 %v2052_v53 }
 0x312   : > { %1902 = vmatprep.subr.bf16.mxu1 %v2118_v62 }
 0x315   : > { %1903 = vmatpush3.bf16.msra.mxu1 %v2053_v54 }
 0x316   : > { %1904 = vmatprep.subr.bf16.mxu1 %v2118_v62 }
 0x319   : > { %1905 = vmatpush3.bf16.msra.mxu1 %v2054_v55 }
 0x31a   : > { %1906 = vmatprep.subr.bf16.mxu1 %v2118_v62 }
 0x31d   : > { %1907 = vmatpush3.bf16.msra.mxu1 %v2055_v56 }
 0x31e   : > { %1908 = vmatprep.subr.bf16.mxu1 %v2118_v62 }
 0x321   : > { %1909 = vmatpush3.bf16.msra.mxu1 %v2056_v6 }
 0x322   : > { %1910 = vmatprep.subr.bf16.mxu1 %v2118_v62 }
 0x325   : > { %1911 = vmatpush3.bf16.msra.mxu1 %v2057_v7 }
 0x326   : > { %1936 = vmatprep.subr.bf16.mxu1 %v2118_v62 }
 0x3db   : > { %v1122_v58 = vpop.f32.mrb[4].mxu1 }
 0x3dc   : > { %v1123_v59 = vadd.f32 %v1733_v57, %v1122_v58  ;;  %v1874_v60 = vpop.f32.mrb[5].mxu1 }
 0x3dd   : > { %v1125_v61 = vpop.f32.mrb[6].mxu1 }
 0x3de   : > { %v1126_v63 = vadd.f32 %v1733_v57, %v1125_v61  ;;  %v1875_v2 = vpop.f32.mrb[7].mxu1  ;;  %v1129_v3 = vmax.f32 %v1123_v59, 0.0 }
 0x3e0   : > { %v1130_v4 = vmax.f32 %v1126_v63, 0.0 }
 0x3e2   : > { %v1131_v5 = vpack.c.bf16 %v1130_v4, %v1129_v3 }
 0x3e4   : > { %1893 = vmatmul.mubr.bf16.vlgmr.msra.gmra.mrb[4].mxu0 %v1131_v5 }
 0x3e5   : > { %1932 = vmatprep.mubr.msk.bf16.mxu0 %vm2119_vm1, %v2118_v62  ;;  %1917 = vmatpush3.bf16.msra.mxu0 %v2058_v8 }
 0x3e6   : > { %1918 = vmatprep.subr.bf16.mxu0 %v2118_v62 }
 0x3e9   : > { %1919 = vmatpush3.bf16.msra.mxu0 %v2059_v10 }
 0x3ea   : > { %1920 = vmatprep.subr.bf16.mxu0 %v2118_v62 }
 0x3ed   : > { %1921 = vmatpush3.bf16.msra.mxu0 %v2060_v11 }
 0x3ee   : > { %1922 = vmatprep.subr.bf16.mxu0 %v2118_v62 }
 0x3f1   : > { %1923 = vmatpush3.bf16.msra.mxu0 %v2061_v12 }
 0x3f2   : > { %1924 = vmatprep.subr.bf16.mxu0 %v2118_v62 }
 0x3f5   : > { %1925 = vmatpush3.bf16.msra.mxu0 %v2062_v13 }
 0x3f6   : > { %1926 = vmatprep.subr.bf16.mxu0 %v2118_v62 }
 0x3f9   : > { %1927 = vmatpush3.bf16.msra.mxu0 %v2063_v14 }
 0x3fa   : > { %1928 = vmatprep.subr.bf16.mxu0 %v2118_v62 }
 0x3fd   : > { %1929 = vmatpush3.bf16.msra.mxu0 %v2064_v24 }
 0x3fe   : > { %1930 = vmatprep.subr.bf16.mxu0 %v2118_v62 }
 0x401   : > { %1931 = vmatpush3.bf16.msra.mxu0 %v2065_v25 }
 0x4b7   : > { %v1237_v16 = vpop.f32.mrb[4].mxu0 }
 0x4b8   : > { %v1238_v0 = vadd.f32 %v1742_v15, %v1237_v16  ;;  %v1894_v17 = vpop.f32.mrb[5].mxu0 }
 0x4b9   : > { %v1240_v18 = vpop.f32.mrb[6].mxu0 }
 0x4ba   : > { %v1241_v19 = vadd.f32 %v1742_v15, %v1240_v18  ;;  %v1895_v9 = vpop.f32.mrb[7].mxu0  ;;  %v1244_v21 = vmax.f32 %v1238_v0, 0.0 }
 0x4bc   : > { %v1245_v22 = vmax.f32 %v1241_v19, 0.0 }
 0x4be   : > { %v1246_v23 = vpack.c.bf16 %v1245_v22, %v1244_v21 }
 0x4c0   : > { %1913 = vmatmul.mubr.bf16.vlgmr.msra.gmra.mrb[8].mxu1 %v1246_v23 }
 0x4c1   : > { %1952 = vmatprep.mubr.msk.bf16.mxu1 %vm2119_vm1, %v2118_v62  ;;  %1937 = vmatpush3.bf16.msra.mxu1 %v2066_v26 }
 0x4c2   : > { %1938 = vmatprep.subr.bf16.mxu1 %v2118_v62 }
 0x4c5   : > { %1939 = vmatpush3.bf16.msra.mxu1 %v2067_v27 }
 0x4c6   : > { %1940 = vmatprep.subr.bf16.mxu1 %v2118_v62 }
 0x4c9   : > { %1941 = vmatpush3.bf16.msra.mxu1 %v2068_v1 }
 0x4ca   : > { %1942 = vmatprep.subr.bf16.mxu1 %v2118_v62 }
 0x4cd   : > { %1943 = vmatpush3.bf16.msra.mxu1 %v2069_v28 }
 0x4ce   : > { %1944 = vmatprep.subr.bf16.mxu1 %v2118_v62 }
 0x4d1   : > { %1945 = vmatpush3.bf16.msra.mxu1 %v2070_v29 }
 0x4d2   : > { %1946 = vmatprep.subr.bf16.mxu1 %v2118_v62 }
 0x4d5   : > { %1947 = vmatpush3.bf16.msra.mxu1 %v2071_v30 }
 0x4d6   : > { %1948 = vmatprep.subr.bf16.mxu1 %v2118_v62 }
 0x4d9   : > { %1949 = vmatpush3.bf16.msra.mxu1 %v2072_v40 }
 0x4da   : > { %1950 = vmatprep.subr.bf16.mxu1 %v2118_v62  ;;  %v1769_v62 = vld [vmem:[%s2542_s14] ss:$0 sm:$0xff] }
 0x4dd   : > { %1951 = vmatpush3.bf16.msra.mxu1 %v2073_v41 }
 0x593   : > { %v1352_v32 = vpop.f32.mrb[8].mxu1 }
 0x594   : > { %v1353_v33 = vadd.f32 %v1751_v31, %v1352_v32  ;;  %v1914_v34 = vpop.f32.mrb[9].mxu1 }
 0x595   : > { %v1355_v20 = vpop.f32.mrb[10].mxu1 }
 0x596   : > { %v1356_v35 = vadd.f32 %v1751_v31, %v1355_v20  ;;  %v1915_v36 = vpop.f32.mrb[11].mxu1  ;;  %v1359_v37 = vmax.f32 %v1353_v33, 0.0 }
 0x598   : > { %v1360_v38 = vmax.f32 %v1356_v35, 0.0 }
 0x59a   : > { %v1361_v39 = vpack.c.bf16 %v1360_v38, %v1359_v37 }
 0x59c   : > { %1933 = vmatmul.mubr.bf16.vlgmr.msra.gmra.mrb[8].mxu0 %v1361_v39 }
 0x66f   : > { %v1467_v43 = vpop.f32.mrb[8].mxu0 }
 0x670   : > { %v1468_v44 = vadd.f32 %v1760_v42, %v1467_v43  ;;  %v1934_v45 = vpop.f32.mrb[9].mxu0 }
 0x671   : > { %v1470_v46 = vpop.f32.mrb[10].mxu0 }
 0x672   : > { %v1471_v47 = vadd.f32 %v1760_v42, %v1470_v46  ;;  %v1935_v48 = vpop.f32.mrb[11].mxu0  ;;  %v1474_v49 = vmax.f32 %v1468_v44, 0.0 }
 0x674   : > { %v1475_v50 = vmax.f32 %v1471_v47, 0.0 }
 0x676   : > { %v1476_v51 = vpack.c.bf16 %v1475_v50, %v1474_v49 }
 0x678   : > { %1953 = vmatmul.mubr.bf16.vlgmr.msra.gmra.mrb[12].mxu1 %v1476_v51 }
 0x74b   : > { %v1582_v52 = vpop.f32.mrb[12].mxu1 }
 0x74c   : > { %v1583_v53 = vadd.f32 %v1769_v62, %v1582_v52  ;;  %v1954_v54 = vpop.f32.mrb[13].mxu1 }
 0x74d   : > { %v1585_v55 = vpop.f32.mrb[14].mxu1 }
 0x74e   : > { %1589 = vst.msk [vmem:[%s566_s27] sm:$0xff] %vm930_vm2, %v1583_v53  ;;  %v1586_v56 = vadd.f32 %v1769_v62, %v1585_v55  ;;  %v1955_v57 = vpop.f32.mrb[15].mxu1 }
 0x750   : > { %1590 = vst.msk [vmem:[%s566_s27 + $0x8] sm:$0xff] %vm930_vm2, %v1586_v56 }
 0x751 PF: > { %s25_s22 = sadd.s32 1, %s2112_s22   ;;  %s2546_s28 = sld [smem:[#allocation2_spill]] }
 0x752   : > { %p22_p7 = scmp.ge.s32.totalorder %s25_s22, 6   ;;  %s2547_s29 = sld [smem:[#allocation3_spill]] }
 0x753   : > { %s2548_s18 = smov %s2104_s20  ;;  %s2549_s19 = smov %s2108_s21 }
 0x754   :  { %24 = sbr.rel (!%p22_p7) target bundleno = 3 (0x3), region = 116 }
 0x757   : > { %s2550_s20 = smov %s2546_s28 }
 0x758   : > { %s2551_s21 = smov %s2547_s29 }

// kernel: tpu_custom_call.1
= control target key start
LH: loop header
LB: loop body
LE: loop exit
PB: predicated region body
PF: predicated region fallthrough
CT: control target
= control target key end

     0   :  { %s2200_s18 = smov 0   ;;  %s2202_s19 = smov 0   ;;  %s2528_s0 = inlined_call_operand.vmem [shape: f32[2,32,2], index: 0, kind: input, shape index: {}]   ;;  %s2529_s1 = inlined_call_operand.vmem [shape: bf16[2,256,8], index: 1, kind: input, shape index: {}]   ;;  %s2530_s2 = inlined_call_operand.vmem [shape: f32[2,1,128], index: 2, kind: input, shape index: {}]   ;;  %s2531_s3 = inlined_call_operand.vmem [shape: f32[2,128], index: 3, kind: input, shape index: {}]   ;;  %s2532_s4 = inlined_call_operand.vmem [shape: bf16[8,128], index: 4, kind: input, shape index: {}]   ;;  %s2533_s5 = inlined_call_operand.vmem [shape: bf16[128,128], index: 5, kind: input, shape index: {}]   ;;  %s2534_s6 = inlined_call_operand.vmem [shape: f32[1,128], index: 6, kind: input, shape index: {}]   ;;  %s2535_s7 = inlined_call_operand.vmem [shape: bf16[128,128], index: 7, kind: input, shape index: {}]   ;;  %s2536_s8 = inlined_call_operand.vmem [shape: f32[1,128], index: 8, kind: input, shape index: {}]   ;;  %s2537_s9 = inlined_call_operand.vmem [shape: bf16[128,128], index: 9, kind: input, shape index: {}]   ;;  %s2538_s10 = inlined_call_operand.vmem [shape: f32[1,128], index: 10, kind: input, shape index: {}]   ;;  %s2539_s11 = inlined_call_operand.vmem [shape: bf16[128,128], index: 11, kind: input, shape index: {}]   ;;  %s2540_s12 = inlined_call_operand.vmem [shape: f32[1,128], index: 12, kind: input, shape index: {}]   ;;  %s2541_s13 = inlined_call_operand.vmem [shape: bf16[128,128], index: 13, kind: input, shape index: {}]   ;;  %s2542_s14 = inlined_call_operand.vmem [shape: f32[1,128], index: 14, kind: input, shape index: {}]   ;;  %s2543_s15 = inlined_call_operand.vmem [shape: f32[2,32,8], index: 15, kind: output, shape index: {}]  }
   0x1   :  { %s2204_s20 = smov 0   ;;  %s2206_s21 = smov 0  }
   0x2   :  { %s2208_s22 = smov 0  }
   0x3 LB: > { %s34_s23 = sadd.s32 1, %s2104_s20  ;;  %s37_s24 = sadd.s32 1, %s2108_s21  ;;  %s2112_s22 = sphi %s2208_s22, %s25_s22   ;;  %s2108_s21 = sphi %s2206_s21, %s2551_s21   ;;  %s2104_s20 = sphi %s2204_s20, %s2550_s20   ;;  %s2100_s19 = sphi %s2202_s19, %s2549_s19   ;;  %s2096_s18 = sphi %s2200_s18, %s2548_s18  }
   0x4   : > { %p35_p0 = scmp.ge.s32.totalorder %s34_s23, 2  ;;  %p1706_p1 = scmp.ge.s32.totalorder %s2112_s22, 1 }
   0x5   : > { %p476_p2 = scmp.lt.s32.totalorder %s2112_s22, 5 }
   0x6   : > { %s2553_s23 = smov (%p35_p0, %s34_s23), 0  ;;  %s2555_s24 = smov (!%p35_p0, %s37_s24), %s2108_s21 }
   0x7   : > { %2544 = sst [smem:[#allocation2_spill]] %s2553_s23  ;;  %p477_p3 = pnand %p1706_p1, %p476_p2 }
   0x8   : > { %p39_p4 = scmp.ge.s32.totalorder %s2555_s24, 2  ;;  %s1707_s25 = sshll.u32 (!%p477_p3), %s2096_s18, 1  ;;  %v2115_v24 = vmov (!%p477_p3), 0   ;;  %v2117_v48 = vmov (!%p477_p3), 1  }
   0x9   : > { %480 = sbr.rel (%p477_p3) target bundleno = 1873 (0x751), region = 80  ;;  %p541_p5 = scmp.lt.s32.totalorder (!%p477_p3), %s2100_s19, 1  ;;  %2010 = vset.pattern.permute.xlu1 (!%p477_p3), %v2115_v24  ;;  %2011 = vset.pattern.permute.xlu0 (!%p477_p3), %v2115_v24 }
   0xa   : > { %s2557_s24 = smov (%p39_p4, %s2555_s24), 0  ;;  %p543_p6 = scmp.lt.s32.totalorder (!%p477_p3), %s1707_s25, 3 }
   0xb   : > { %2545 = sst [smem:[#allocation3_spill]] %s2557_s24  ;;  %s2116_s24 = smov (!%p477_p3), 1  }
  0x10   : > { %s2559_s19 = smov (!%p541_p5, %s2100_s19), 1  ;;  %s2561_s25 = smov (!%p543_p6, %s1707_s25), 3 }
  0x11   : > { %s1708_s26 = sshll.u32 %s2559_s19, 2  ;;  %s1780_s27 = sshll.u32 %s2559_s19, 7 }
  0x12   : > { %s2234_s28 = sadd.s32 %s1708_s26, %s2561_s25  ;;  %s2239_s16 = scalar_lea.vmem %s2529_s1, %s1780_s27 }
  0x13   : > { %s1709_s17 = sshll.u32 %s2234_s28, 3  ;;  %v2018_v49 = vld [vmem:[%s2239_s16 + $0x40] sm:$0xff]   ;;  %v2020_v53 = vld [vmem:[%s2239_s16 + $0x48] sm:$0xff]   ;;  %v2022_v58 = vld [vmem:[%s2239_s16 + $0x50] sm:$0xff]  }
  0x14   : > { %s548_s23 = scalar_lea.vmem %s2528_s0, %s1709_s17  ;;  %v2019_v51 = vld [vmem:[%s2239_s16] sm:$0xff]   ;;  %1781 = vmatprep.subr.bf16.mxu0 %v2018_v49  ;;  %v2021_v56 = vld [vmem:[%s2239_s16 + $0x8] sm:$0xff]   ;;  %v2023_v60 = vld [vmem:[%s2239_s16 + $0x10] sm:$0xff]   ;;  %s566_s27 = scalar_lea.vmem %s2543_s15, %s1709_s17 }
  0x15   : > { %v2247_v0 = vld [vmem:[%s548_s23] sm:$0xff]  ;;  %v2249_v1 = vld [vmem:[%s548_s23 + $0x8] sm:$0xff]  ;;  %s2114_s23 = smov 127   ;;  %1782 = vmatpush3.bf16.msra.mxu0 %v2019_v51  ;;  %v2024_v62 = vld [vmem:[%s2239_s16 + $0x58] sm:$0xff]  }
  0x16   : > { %v571_v2 = vadd.f32 1.0, %v2247_v0  ;;  %v572_v3 = vadd.f32 1.0, %v2249_v1  ;;  %1783 = vmatprep.subr.bf16.mxu0 %v2020_v53 }
  0x18   : > { %v573_v4 = vmul.f32 7.5, %v571_v2  ;;  %v574_v5 = vmul.f32 7.5, %v572_v3  ;;  %v2025_v2 = vld [vmem:[%s2239_s16 + $0x18] sm:$0xff]   ;;  %v2026_v3 = vld [vmem:[%s2239_s16 + $0x60] sm:$0xff]  }
  0x19   : > { %1784 = vmatpush3.bf16.msra.mxu0 %v2021_v56 }
  0x1a   : > { %v575_v6 = vfloor.f32 %v573_v4  ;;  %v576_v7 = vfloor.f32 %v574_v5  ;;  %1785 = vmatprep.subr.bf16.mxu0 %v2022_v58 }
  0x1c   : > { %v2253_v8 = vsub.f32 %v573_v4, %v575_v6  ;;  %v2255_v9 = vsub.f32 %v574_v5, %v576_v7  ;;  %v579_v10 = vmax.f32 %v575_v6, 0.0  ;;  %v585_v11 = vadd.f32 1.0, %v575_v6  ;;  %v2027_v5 = vld [vmem:[%s2239_s16 + $0x20] sm:$0xff]   ;;  %v2028_v6 = vld [vmem:[%s2239_s16 + $0x68] sm:$0xff]  }
  0x1d   : > { %v580_v12 = vmax.f32 %v576_v7, 0.0  ;;  %v586_v13 = vadd.f32 1.0, %v576_v7  ;;  %1786 = vmatpush3.bf16.msra.mxu0 %v2023_v60 }
  0x1e   : > { %v614_v14 = vsub.f32 1.0, %v2253_v8  ;;  %v615_v15 = vsub.f32 1.0, %v2255_v9  ;;  %v581_v16 = vmin.f32 %v579_v10, 15.0  ;;  %v587_v17 = vmax.f32 %v585_v11, 0.0  ;;  %1787 = vmatprep.subr.bf16.mxu0 %v2024_v62  ;;  %v2030_v10 = vld [vmem:[%s2239_s16 + $0x70] sm:$0xff]  }
  0x1f   : > { %v582_v18 = vmin.f32 %v580_v12, 15.0  ;;  %v588_v19 = vmax.f32 %v586_v13, 0.0  ;;  %v2031_v11 = vld [vmem:[%s2239_s16 + $0x30] sm:$0xff]   ;;  %v2032_v13 = vld [vmem:[%s2239_s16 + $0x78] sm:$0xff]   ;;  %v2118_v62 = vmov 0.0  }
  0x20   : > { %618 = vrot.lane.b32.xlu0 %v614_v14, %s2114_s23  ;;  %620 = vrot.lane.b32.xlu1 %v615_v15, %s2114_s23  ;;  %v1956_v20 = vtrunc.f32 %v581_v16  ;;  %v589_v21 = vmin.f32 %v587_v17, 15.0 }
  0x21   : > { %v1958_v22 = vtrunc.f32 %v582_v18  ;;  %v590_v23 = vmin.f32 %v588_v19, 15.0  ;;  %1788 = vmatpush3.bf16.msra.mxu0 %v2025_v2  ;;  %1850 = vmatprep.subr.bf16.mxu1 %v2118_v62 }
  0x22   : > { %v2261_v25 = vcvt.f32.s32 %v1956_v20  ;;  %v1960_v26 = vtrunc.f32 %v589_v21  ;;  %1789 = vmatprep.subr.bf16.mxu0 %v2026_v3  ;;  %v593_v20 = vlaneseq }
  0x23   : > { %v1962_v27 = vtrunc.f32 %v590_v23  ;;  %v1959_v29 = vcvt.f32.s32 %v1958_v22 }
  0x24   : > { %598 = vrot.lane.b32.xlu0 %v2261_v25, %s2116_s24  ;;  %v2264_v28 = vcvt.f32.s32 %v1960_v26  ;;  %v596_v43 = vmul.u32 16, %v2261_v25  ;;  %v594_v22 = vand.u32 127, %v593_v20 }
  0x25   : > { %v2267_v30 = vcvt.f32.s32 %v1962_v27  ;;  %v597_v50 = vmul.u32 16, %v1959_v29  ;;  %1790 = vmatpush3.bf16.msra.mxu0 %v2027_v5 }
  0x26   : > { %640 = vrot.lane.b32.xlu1 %v2264_v28, %s2116_s24  ;;  %v676_v45 = vmul.u32 16, %v2264_v28  ;;  %1791 = vmatprep.subr.bf16.mxu0 %v2028_v6  ;;  %v595_v25 = vadd.s32 128, %v594_v22 }
  0x27   : > { %v677_v54 = vmul.u32 16, %v2267_v30 }
  0x28   : > { %600 = vrot.lane.b32.xlu0 %v1959_v29, %s2116_s24 }
  0x2a   : > { %642 = vrot.lane.b32.xlu1 %v2267_v30, %s2116_s24 }
  0x2c   : > { %692 = vrot.lane.b32.xlu0 %v2253_v8, %s2114_s23 }
  0x2e   : > { %694 = vrot.lane.b32.xlu1 %v2255_v9, %s2114_s23  ;;  %s557_s23 = scalar_lea.vmem %s2530_s2, %s2559_s19 }
  0x92   : > { %v619_v31 = vpop.permute.xlu0 %618  ;;  %v621_v32 = vpop.permute.xlu1 %620 }
  0x93   : > { %v624_v41 = vmul.f32 %v619_v31, %v614_v14  ;;  %v625_v42 = vmul.f32 %v621_v32, %v615_v15  ;;  %v656_v44 = vmul.f32 %v619_v31, %v2253_v8  ;;  %v657_v47 = vmul.f32 %v621_v32, %v2255_v9 }
  0x96   : > { %v599_v33 = vpop.permute.xlu0 %598 }
  0x97   : > { %v602_v46 = vadd.s32 %v599_v33, %v596_v43  ;;  %v678_v52 = vadd.s32 %v676_v45, %v599_v33 }
  0x98   : > { %v641_v34 = vpop.permute.xlu1 %640 }
  0x99   : > { %v644_v63 = vadd.s32 %v641_v34, %v596_v43  ;;  %v718_v4 = vadd.s32 %v676_v45, %v641_v34 }
  0x9a   : > { %v601_v35 = vpop.permute.xlu0 %600 }
  0x9b   : > { %v603_v55 = vadd.s32 %v601_v35, %v597_v50  ;;  %v679_v59 = vadd.s32 %v677_v54, %v601_v35 }
  0x9c   : > { %v643_v36 = vpop.permute.xlu1 %642 }
  0x9d   : > { %v645_v57 = vadd.s32 %v643_v36, %v597_v50  ;;  %v719_v7 = vadd.s32 %v677_v54, %v643_v36 }
  0x9e   : > { %v693_v37 = vpop.permute.xlu0 %692 }
  0x9f   : > { %v698_v38 = vmul.f32 %v693_v37, %v614_v14  ;;  %v730_v61 = vmul.f32 %v693_v37, %v2253_v8  ;;  %v2029_v8 = vld [vmem:[%s2239_s16 + $0x28] sm:$0xff]   ;;  %v2033_v14 = vld [vmem:[%s2239_s16 + $0x38] sm:$0xff]  }
  0xa0   : > { %v2272_v39 = vpop.permute.xlu1 %694  ;;  %1792 = vmatpush3.bf16.msra.mxu0 %v2029_v8  ;;  %v2034_v8 = vld [vmem:[%s2533_s5] sm:$0xff]  }
  0xa1   : > { %v699_v40 = vmul.f32 %v2272_v39, %v615_v15  ;;  %702 = vperm.xlu1 %2010, %v698_v38   ;;  %1793 = vmatprep.subr.bf16.mxu0 %v2030_v10  ;;  %v731_v12 = vmul.f32 %v2272_v39, %v2255_v9 }
  0xa3   : > { %707 = vperm.xlu0 %2011, %v699_v40  }
  0xa4   : > { %1794 = vmatpush3.bf16.msra.mxu0 %v2031_v11  ;;  %v2035_v11 = vld [vmem:[%s2533_s5 + $0x8] sm:$0xff]  }
  0xa5   : > { %628 = vperm.xlu1 %2010, %v624_v41   ;;  %1795 = vmatprep.subr.bf16.mxu0 %v2032_v13  ;;  %v2037_v13 = vld [vmem:[%s2533_s5 + $0x18] sm:$0xff]  }
  0xa7   : > { %633 = vperm.xlu0 %2011, %v625_v42  }
  0xa8   : > { %1796 = vmatpush3.bf16.msra.mxu0 %v2033_v14  ;;  %v2038_v14 = vld [vmem:[%s2533_s5 + $0x20] sm:$0xff]  }
  0xa9   : > { %660 = vperm.xlu1 %2010, %v656_v44   ;;  %1876 = vmatprep.subr.bf16.mxu0 %v2118_v62 }
  0xab   : > { %2012 = vset.pattern.permute.xlu0 %v2117_v48 }
  0xac   : > { %605 = vperm.xlu0 %2012, %v602_v46  }
  0xad   : > { %665 = vperm.xlu1 %2010, %v657_v47  }
  0xb0   : > { %681 = vperm.xlu0 %2012, %v678_v52  }
  0xb1   : > { %2013 = vset.pattern.permute.xlu1 %v2117_v48 }
  0xb2   : > { %608 = vperm.xlu1 %2013, %v603_v55  }
  0xb4   : > { %650 = vperm.xlu0 %2012, %v645_v57  }
  0xb6   : > { %684 = vperm.xlu1 %2013, %v679_v59  }
  0xb8   : > { %2014 = vset.pattern.permute.xlu0 %v2115_v24 }
  0xb9   : > { %734 = vperm.xlu0 %2014, %v730_v61   ;;  %v922_v61 = vld [vmem:[%s2532_s4] sm:$0xf] }
  0xba   : > { %647 = vperm.xlu1 %2013, %v644_v63  }
  0xbd   : > { %982 = vperm.xlu0 %2014, %v2247_v0  }
  0xbe   : > { %721 = vperm.xlu1 %2013, %v718_v4  }
  0xc1   : > { %2016 = vset.pattern.permute.xlu0 %v2117_v48 }
  0xc2   : > { %724 = vperm.xlu1 %2013, %v719_v7   ;;  %999 = vperm.xlu0 %2016, %v2247_v0  }
  0xc6   : > { %2015 = vset.pattern.permute.xlu1 %v2115_v24 }
  0xc7   : > { %739 = vperm.xlu1 %2015, %v731_v12   ;;  %v2036_v12 = vld [vmem:[%s2533_s5 + $0x10] sm:$0xff]  }
  0xcb   : > { %987 = vperm.xlu1 %2015, %v2249_v1  }
  0xcf   : > { %2017 = vset.pattern.permute.xlu1 %v2117_v48 }
  0xd0   : > { %1003 = vperm.xlu1 %2017, %v2249_v1  }
 0x120   : > { %v703_v15 = vpop.permute.xlu1 %702 }
 0x122   : > { %v708_v16 = vpop.permute.xlu0 %707 }
 0x124   : > { %v629_v0 = vpop.permute.xlu1 %628 }
 0x126   : > { %v634_v17 = vpop.permute.xlu0 %633 }
 0x128   : > { %v661_v18 = vpop.permute.xlu1 %660 }
 0x12b   : > { %v606_v9 = vpop.permute.xlu0 %605 }
 0x12c   : > { %v666_v19 = vpop.permute.xlu1 %665  ;;  %vm610_vm2 = vcmp.eq.s32.totalorder %v594_v22, %v606_v9  ;;  %vm611_vm3 = vcmp.eq.s32.totalorder %v595_v25, %v606_v9  ;;  %v2045_v9 = vld [vmem:[%s2535_s7 + $0x18] sm:$0xff]  }
 0x12d   : > { %v636_v30 = vsel %vm610_vm2, %v629_v0, 0.0  ;;  %v637_v31 = vsel %vm611_vm3, %v629_v0, 0.0  ;;  %vm930_vm2 = vcmask 64512   ;;  %v2041_v0 = vld [vmem:[%s2533_s5 + $0x38] sm:$0xff]  }
 0x12f   : > { %v682_v23 = vpop.permute.xlu0 %681 }
 0x130   : > { %vm686_vm8 = vcmp.eq.s32.totalorder %v594_v22, %v682_v23  ;;  %vm687_vm9 = vcmp.eq.s32.totalorder %v595_v25, %v682_v23  ;;  %v991_v23 = vshrl.u32 %v593_v20, 7 }
 0x131   : > { %v609_v21 = vpop.permute.xlu1 %608  ;;  %v710_v41 = vsel %vm686_vm8, %v703_v15, 0.0  ;;  %v711_v42 = vsel %vm687_vm9, %v703_v15, 0.0  ;;  %v2039_v15 = vld [vmem:[%s2533_s5 + $0x28] sm:$0xff]  }
 0x132   : > { %vm612_vm6 = vcmp.eq.s32.totalorder %v594_v22, %v609_v21  ;;  %vm613_vm7 = vcmp.eq.s32.totalorder %v595_v25, %v609_v21  ;;  %v2046_v21 = vld [vmem:[%s2535_s7 + $0x20] sm:$0xff]  }
 0x133   : > { %v651_v26 = vpop.permute.xlu0 %650  ;;  %v638_v36 = vsel %vm612_vm6, %v634_v17, 0.0  ;;  %v639_v37 = vsel %vm613_vm7, %v634_v17, 0.0  ;;  %v2042_v17 = vld [vmem:[%s2535_s7] sm:$0xff]  }
 0x134   : > { %vm654_vm4 = vcmp.eq.s32.totalorder %v594_v22, %v651_v26  ;;  %vm655_vm5 = vcmp.eq.s32.totalorder %v595_v25, %v651_v26  ;;  %v979_v26 = vld [vmem:[%s2531_s3] sm:$0x3] }
 0x135   : > { %v685_v24 = vpop.permute.xlu1 %684  ;;  %v670_v32 = vsel %vm654_vm4, %v666_v19, 0.0  ;;  %v671_v33 = vsel %vm655_vm5, %v666_v19, 0.0  ;;  %v2044_v19 = vld [vmem:[%s2535_s7 + $0x10] sm:$0xff]  }
 0x136   : > { %vm688_vm10 = vcmp.eq.s32.totalorder %v594_v22, %v685_v24  ;;  %vm689_vm11 = vcmp.eq.s32.totalorder %v595_v25, %v685_v24  ;;  %v674_v39 = vadd.f32 %v670_v32, %v638_v36  ;;  %v675_v40 = vadd.f32 %v671_v33, %v639_v37 }
 0x137   : > { %v712_v43 = vsel %vm688_vm10, %v708_v16, 0.0  ;;  %v713_v44 = vsel %vm689_vm11, %v708_v16, 0.0  ;;  %v2040_v16 = vld [vmem:[%s2533_s5 + $0x30] sm:$0xff]   ;;  %v992_v24 = vsub.s32 0, %v991_v23 }
 0x138   : > { %v735_v45 = vpop.permute.xlu0 %734  ;;  %v716_v50 = vadd.f32 %v712_v43, %v674_v39  ;;  %v717_v51 = vadd.f32 %v713_v44, %v675_v40 }
 0x139   : > { %v648_v27 = vpop.permute.xlu1 %647 }
 0x13a   : > { %vm652_vm0 = vcmp.eq.s32.totalorder %v594_v22, %v648_v27  ;;  %vm653_vm1 = vcmp.eq.s32.totalorder %v595_v25, %v648_v27 }
 0x13b   : > { %v668_v1 = vsel %vm652_vm0, %v661_v18, 0.0  ;;  %v669_v28 = vsel %vm653_vm1, %v661_v18, 0.0  ;;  %vm934_vm0 = vcmask 1043456   ;;  %vm2119_vm1 = vmmov 0   ;;  %v2043_v18 = vld [vmem:[%s2535_s7 + $0x8] sm:$0xff]  }
 0x13c   : > { %v672_v34 = vadd.f32 %v668_v1, %v636_v30  ;;  %v673_v35 = vadd.f32 %v669_v28, %v637_v31  ;;  %v936_v63 = vsel %vm934_vm0, %v922_v61, 0  ;;  %1852 = vmatprep.mubr.msk.bf16.mxu1 %vm2119_vm1, %v2118_v62  ;;  %v983_v27 = vpop.permute.xlu0 %982  ;;  %v993_v28 = vrot.slane %v979_v26, %v992_v24  ;;  %v1731_v30 = vld [vmem:[%s557_s23] ss:$0 sm:$0xff]  ;;  %v2064_v24 = vld [vmem:[%s2539_s11 + $0x30] sm:$0xff]  }
 0x13d   : > { %v722_v29 = vpop.permute.xlu1 %721  ;;  %1851 = vmatpush3.bf16.msra.mxu1 %v936_v63 }
 0x13e   : > { %vm726_vm12 = vcmp.eq.s32.totalorder %v594_v22, %v722_v29  ;;  %vm727_vm13 = vcmp.eq.s32.totalorder %v595_v25, %v722_v29  ;;  %v714_v46 = vadd.f32 %v710_v41, %v672_v34  ;;  %v715_v47 = vadd.f32 %v711_v42, %v673_v35  ;;  %1856 = vmatprep.subr.bf16.mxu1 %v2118_v62 }
 0x13f   : > { %v742_v48 = vsel %vm726_vm12, %v735_v45, 0.0  ;;  %v743_v49 = vsel %vm727_vm13, %v735_v45, 0.0  ;;  %v994_v34 = vmul.f32 %v993_v28, %v983_v27  ;;  %v2067_v27 = vld [vmem:[%s2541_s13 + $0x8] sm:$0xff]  }
 0x140   : > { %v746_v55 = vadd.f32 %v742_v48, %v714_v46  ;;  %v747_v57 = vadd.f32 %v743_v49, %v715_v47  ;;  %v2048_v49 = vld [vmem:[%s2535_s7 + $0x30] sm:$0xff]  }
 0x141   : > { %v725_v38 = vpop.permute.xlu1 %724  ;;  %v1000_v31 = vpop.permute.xlu0 %999 }
 0x142   : > { %vm728_vm14 = vcmp.eq.s32.totalorder %v594_v22, %v725_v38  ;;  %vm729_vm15 = vcmp.eq.s32.totalorder %v595_v25, %v725_v38  ;;  %v2047_v22 = vld [vmem:[%s2535_s7 + $0x28] sm:$0xff]   ;;  %v1008_v25 = vsub.s32 1, %v991_v23 }
 0x144   : > { %v1009_v29 = vrot.slane %v979_v26, %v1008_v25  ;;  %v2065_v25 = vld [vmem:[%s2539_s11 + $0x38] sm:$0xff]   ;;  %v2066_v26 = vld [vmem:[%s2541_s13] sm:$0xff]  }
 0x146   : > { %v740_v52 = vpop.permute.xlu1 %739  ;;  %v1010_v36 = vmul.f32 %v1009_v29, %v1000_v31  ;;  %v1751_v31 = vld [vmem:[%s2538_s10] ss:$0 sm:$0xff] }
 0x147   : > { %v744_v53 = vsel %vm728_vm14, %v740_v52, 0.0  ;;  %v745_v54 = vsel %vm729_vm15, %v740_v52, 0.0  ;;  %v2051_v52 = vld [vmem:[%s2537_s9 + $0x8] sm:$0xff]  }
 0x148   : > { %v748_v56 = vadd.f32 %v744_v53, %v716_v50  ;;  %v749_v58 = vadd.f32 %v745_v54, %v717_v51  ;;  %v2049_v50 = vld [vmem:[%s2535_s7 + $0x38] sm:$0xff]   ;;  %v2050_v51 = vld [vmem:[%s2537_s9] sm:$0xff]   ;;  %v2052_v53 = vld [vmem:[%s2537_s9 + $0x10] sm:$0xff]  }
 0x149   : > { %v2053_v54 = vld [vmem:[%s2537_s9 + $0x18] sm:$0xff]  }
 0x14a   : > { %v751_v59 = vpack.c.bf16 %v749_v58, %v747_v57  ;;  %v750_v60 = vpack.c.bf16 %v748_v56, %v746_v55  ;;  %v988_v1 = vpop.permute.xlu1 %987  ;;  %v2054_v55 = vld [vmem:[%s2537_s9 + $0x20] sm:$0xff]   ;;  %v2055_v56 = vld [vmem:[%s2537_s9 + $0x28] sm:$0xff]  }
 0x14b   : > { %v995_v38 = vmul.f32 %v993_v28, %v988_v1  ;;  %v1733_v57 = vld [vmem:[%s2534_s6] ss:$0 sm:$0xff]  ;;  %v2068_v1 = vld [vmem:[%s2541_s13 + $0x10] sm:$0xff]   ;;  %v2069_v28 = vld [vmem:[%s2541_s13 + $0x18] sm:$0xff]  }
 0x14c   : > { %912 = vmatprep.mubr.bf16.mxu0 %v751_v59 }
 0x14d   : > { %913 = vmatmul.mubr.bf16.vlgmr.msra.gmra.mrb[0].mxu0 %v750_v60 }
 0x14e   : > { %1892 = vmatprep.mubr.msk.bf16.mxu0 %vm2119_vm1, %v2118_v62  ;;  %1877 = vmatpush3.bf16.msra.mxu0 %v2042_v17 }
 0x14f   : > { %1878 = vmatprep.subr.bf16.mxu0 %v2118_v62  ;;  %v1004_v33 = vpop.permute.xlu1 %1003 }
 0x150   : > { %v1011_v42 = vmul.f32 %v1009_v29, %v1004_v33  ;;  %v2070_v29 = vld [vmem:[%s2541_s13 + $0x20] sm:$0xff]  }
 0x152   : > { %1879 = vmatpush3.bf16.msra.mxu0 %v2043_v18 }
 0x153   : > { %1880 = vmatprep.subr.bf16.mxu0 %v2118_v62 }
 0x156   : > { %1881 = vmatpush3.bf16.msra.mxu0 %v2044_v19 }
 0x157   : > { %1882 = vmatprep.subr.bf16.mxu0 %v2118_v62 }
 0x15a   : > { %1883 = vmatpush3.bf16.msra.mxu0 %v2045_v9 }
 0x15b   : > { %1884 = vmatprep.subr.bf16.mxu0 %v2118_v62 }
 0x15e   : > { %1885 = vmatpush3.bf16.msra.mxu0 %v2046_v21 }
 0x15f   : > { %1886 = vmatprep.subr.bf16.mxu0 %v2118_v62 }
 0x162   : > { %1887 = vmatpush3.bf16.msra.mxu0 %v2047_v22 }
 0x163   : > { %1888 = vmatprep.subr.bf16.mxu0 %v2118_v62 }
 0x166   : > { %1889 = vmatpush3.bf16.msra.mxu0 %v2048_v49 }
 0x167   : > { %1890 = vmatprep.subr.bf16.mxu0 %v2118_v62 }
 0x16a   : > { %1891 = vmatpush3.bf16.msra.mxu0 %v2049_v50 }
 0x16b   : > { %1916 = vmatprep.subr.bf16.mxu0 %v2118_v62 }
 0x220   : > { %v1797_v2 = vpop.f32.mrb[0].mxu0 }
 0x221   : > { %v1798_v3 = vpop.f32.mrb[1].mxu0 }
 0x222   : > { %v1799_v4 = vadd.f32 %v1798_v3, %v1797_v2  ;;  %v1800_v5 = vpop.f32.mrb[2].mxu0 }
 0x223   : > { %v1801_v6 = vpop.f32.mrb[3].mxu0 }
 0x224   : > { %v1802_v7 = vadd.f32 %v1801_v6, %v1800_v5  ;;  %v2056_v6 = vld [vmem:[%s2537_s9 + $0x30] sm:$0xff]  }
 0x226   : > { %v921_v10 = vpack.c.bf16 %v1802_v7, %v1799_v4  ;;  %v2057_v7 = vld [vmem:[%s2537_s9 + $0x38] sm:$0xff]  }
 0x228   : > { %1853 = vmatmul.mubr.msk.bf16.vlgmr.msra.gmra.mrb[0].mxu1 %vm930_vm2, %v921_v10  ;;  %v2059_v10 = vld [vmem:[%s2539_s11 + $0x8] sm:$0xff]  }
 0x229   : > { %1857 = vmatpush3.bf16.msra.mxu1 %v2034_v8  ;;  %1872 = vmatprep.mubr.msk.bf16.mxu1 %vm2119_vm1, %v2118_v62  ;;  %v2058_v8 = vld [vmem:[%s2539_s11] sm:$0xff]  }
 0x22a   : > { %1858 = vmatprep.subr.bf16.mxu1 %v2118_v62 }
 0x22d   : > { %1859 = vmatpush3.bf16.msra.mxu1 %v2035_v11  ;;  %v2060_v11 = vld [vmem:[%s2539_s11 + $0x10] sm:$0xff]  }
 0x22e   : > { %1860 = vmatprep.subr.bf16.mxu1 %v2118_v62 }
 0x231   : > { %1861 = vmatpush3.bf16.msra.mxu1 %v2036_v12  ;;  %v2061_v12 = vld [vmem:[%s2539_s11 + $0x18] sm:$0xff]  }
 0x232   : > { %1862 = vmatprep.subr.bf16.mxu1 %v2118_v62 }
 0x235   : > { %1863 = vmatpush3.bf16.msra.mxu1 %v2037_v13  ;;  %v2062_v13 = vld [vmem:[%s2539_s11 + $0x20] sm:$0xff]  }
 0x236   : > { %1864 = vmatprep.subr.bf16.mxu1 %v2118_v62 }
 0x239   : > { %1865 = vmatpush3.bf16.msra.mxu1 %v2038_v14  ;;  %v2063_v14 = vld [vmem:[%s2539_s11 + $0x28] sm:$0xff]  }
 0x23a   : > { %1866 = vmatprep.subr.bf16.mxu1 %v2118_v62 }
 0x23d   : > { %1867 = vmatpush3.bf16.msra.mxu1 %v2039_v15  ;;  %v1742_v15 = vld [vmem:[%s2536_s8] ss:$0 sm:$0xff] }
 0x23e   : > { %1868 = vmatprep.subr.bf16.mxu1 %v2118_v62 }
 0x241   : > { %1869 = vmatpush3.bf16.msra.mxu1 %v2040_v16 }
 0x242   : > { %1870 = vmatprep.subr.bf16.mxu1 %v2118_v62 }
 0x245   : > { %1871 = vmatpush3.bf16.msra.mxu1 %v2041_v0 }
 0x246   : > { %1896 = vmatprep.subr.bf16.mxu1 %v2118_v62 }
 0x2fb   : > { %v972_v32 = vpop.f32.mrb[0].mxu1 }
 0x2fc   : > { %v973_v20 = vadd.f32 %v1731_v30, %v972_v32  ;;  %v1854_v35 = vpop.f32.mrb[1].mxu1 }
 0x2fd   : > { %v975_v37 = vpop.f32.mrb[2].mxu1 }
 0x2fe   : > { %v996_v39 = vadd.f32 %v994_v34, %v973_v20  ;;  %v976_v40 = vadd.f32 %v1731_v30, %v975_v37  ;;  %v1855_v41 = vpop.f32.mrb[3].mxu1  ;;  %v2071_v30 = vld [vmem:[%s2541_s13 + $0x28] sm:$0xff]  }
 0x2ff   : > { %v2073_v41 = vld [vmem:[%s2541_s13 + $0x38] sm:$0xff]  }
 0x300   : > { %v997_v43 = vadd.f32 %v995_v38, %v976_v40  ;;  %v1012_v44 = vadd.f32 %v1010_v36, %v996_v39  ;;  %v2072_v40 = vld [vmem:[%s2541_s13 + $0x30] sm:$0xff]  }
 0x302   : > { %v1013_v45 = vadd.f32 %v1011_v42, %v997_v43  ;;  %v1014_v46 = vmax.f32 %v1012_v44, 0.0  ;;  %v1760_v42 = vld [vmem:[%s2540_s12] ss:$0 sm:$0xff] }
 0x304   : > { %v1015_v47 = vmax.f32 %v1013_v45, 0.0 }
 0x306   : > { %v1016_v48 = vpack.c.bf16 %v1015_v47, %v1014_v46 }
 0x308   : > { %1873 = vmatmul.mubr.bf16.vlgmr.msra.gmra.mrb[4].mxu1 %v1016_v48 }
 0x309   : > { %1912 = vmatprep.mubr.msk.bf16.mxu1 %vm2119_vm1, %v2118_v62  ;;  %1897 = vmatpush3.bf16.msra.mxu1 %v2050_v51 }
 0x30a   : > { %1898 = vmatprep.subr.bf16.mxu1 %v2118_v62 }
 0x30d   : > { %1899 = vmatpush3.bf16.msra.mxu1 %v2051_v52 }
 0x30e   : > { %1900 = vmatprep.subr.bf16.mxu1 %v2118_v62 }
 0x311   : > { %1901 = vmatpush3.bf16.msra.mxu1 %v2052_v53 }
 0x312   : > { %1902 = vmatprep.subr.bf16.mxu1 %v2118_v62 }
 0x315   : > { %1903 = vmatpush3.bf16.msra.mxu1 %v2053_v54 }
 0x316   : > { %1904 = vmatprep.subr.bf16.mxu1 %v2118_v62 }
 0x319   : > { %1905 = vmatpush3.bf16.msra.mxu1 %v2054_v55 }
 0x31a   : > { %1906 = vmatprep.subr.bf16.mxu1 %v2118_v62 }
 0x31d   : > { %1907 = vmatpush3.bf16.msra.mxu1 %v2055_v56 }
 0x31e   : > { %1908 = vmatprep.subr.bf16.mxu1 %v2118_v62 }
 0x321   : > { %1909 = vmatpush3.bf16.msra.mxu1 %v2056_v6 }
 0x322   : > { %1910 = vmatprep.subr.bf16.mxu1 %v2118_v62 }
 0x325   : > { %1911 = vmatpush3.bf16.msra.mxu1 %v2057_v7 }
 0x326   : > { %1936 = vmatprep.subr.bf16.mxu1 %v2118_v62 }
 0x3db   : > { %v1122_v58 = vpop.f32.mrb[4].mxu1 }
 0x3dc   : > { %v1123_v59 = vadd.f32 %v1733_v57, %v1122_v58  ;;  %v1874_v60 = vpop.f32.mrb[5].mxu1 }
 0x3dd   : > { %v1125_v61 = vpop.f32.mrb[6].mxu1 }
 0x3de   : > { %v1126_v63 = vadd.f32 %v1733_v57, %v1125_v61  ;;  %v1875_v2 = vpop.f32.mrb[7].mxu1  ;;  %v1129_v3 = vmax.f32 %v1123_v59, 0.0 }
 0x3e0   : > { %v1130_v4 = vmax.f32 %v1126_v63, 0.0 }
 0x3e2   : > { %v1131_v5 = vpack.c.bf16 %v1130_v4, %v1129_v3 }
 0x3e4   : > { %1893 = vmatmul.mubr.bf16.vlgmr.msra.gmra.mrb[4].mxu0 %v1131_v5 }
 0x3e5   : > { %1932 = vmatprep.mubr.msk.bf16.mxu0 %vm2119_vm1, %v2118_v62  ;;  %1917 = vmatpush3.bf16.msra.mxu0 %v2058_v8 }
 0x3e6   : > { %1918 = vmatprep.subr.bf16.mxu0 %v2118_v62 }
 0x3e9   : > { %1919 = vmatpush3.bf16.msra.mxu0 %v2059_v10 }
 0x3ea   : > { %1920 = vmatprep.subr.bf16.mxu0 %v2118_v62 }
 0x3ed   : > { %1921 = vmatpush3.bf16.msra.mxu0 %v2060_v11 }
 0x3ee   : > { %1922 = vmatprep.subr.bf16.mxu0 %v2118_v62 }
 0x3f1   : > { %1923 = vmatpush3.bf16.msra.mxu0 %v2061_v12 }
 0x3f2   : > { %1924 = vmatprep.subr.bf16.mxu0 %v2118_v62 }
 0x3f5   : > { %1925 = vmatpush3.bf16.msra.mxu0 %v2062_v13 }
 0x3f6   : > { %1926 = vmatprep.subr.bf16.mxu0 %v2118_v62 }
 0x3f9   : > { %1927 = vmatpush3.bf16.msra.mxu0 %v2063_v14 }
 0x3fa   : > { %1928 = vmatprep.subr.bf16.mxu0 %v2118_v62 }
 0x3fd   : > { %1929 = vmatpush3.bf16.msra.mxu0 %v2064_v24 }
 0x3fe   : > { %1930 = vmatprep.subr.bf16.mxu0 %v2118_v62 }
 0x401   : > { %1931 = vmatpush3.bf16.msra.mxu0 %v2065_v25 }
 0x4b7   : > { %v1237_v16 = vpop.f32.mrb[4].mxu0 }
 0x4b8   : > { %v1238_v0 = vadd.f32 %v1742_v15, %v1237_v16  ;;  %v1894_v17 = vpop.f32.mrb[5].mxu0 }
 0x4b9   : > { %v1240_v18 = vpop.f32.mrb[6].mxu0 }
 0x4ba   : > { %v1241_v19 = vadd.f32 %v1742_v15, %v1240_v18  ;;  %v1895_v9 = vpop.f32.mrb[7].mxu0  ;;  %v1244_v21 = vmax.f32 %v1238_v0, 0.0 }
 0x4bc   : > { %v1245_v22 = vmax.f32 %v1241_v19, 0.0 }
 0x4be   : > { %v1246_v23 = vpack.c.bf16 %v1245_v22, %v1244_v21 }
 0x4c0   : > { %1913 = vmatmul.mubr.bf16.vlgmr.msra.gmra.mrb[8].mxu1 %v1246_v23 }
 0x4c1   : > { %1952 = vmatprep.mubr.msk.bf16.mxu1 %vm2119_vm1, %v2118_v62  ;;  %1937 = vmatpush3.bf16.msra.mxu1 %v2066_v26 }
 0x4c2   : > { %1938 = vmatprep.subr.bf16.mxu1 %v2118_v62 }
 0x4c5   : > { %1939 = vmatpush3.bf16.msra.mxu1 %v2067_v27 }
 0x4c6   : > { %1940 = vmatprep.subr.bf16.mxu1 %v2118_v62 }
 0x4c9   : > { %1941 = vmatpush3.bf16.msra.mxu1 %v2068_v1 }
 0x4ca   : > { %1942 = vmatprep.subr.bf16.mxu1 %v2118_v62 }
 0x4cd   : > { %1943 = vmatpush3.bf16.msra.mxu1 %v2069_v28 }
 0x4ce   : > { %1944 = vmatprep.subr.bf16.mxu1 %v2118_v62 }
 0x4d1   : > { %1945 = vmatpush3.bf16.msra.mxu1 %v2070_v29 }
 0x4d2   : > { %1946 = vmatprep.subr.bf16.mxu1 %v2118_v62 }
 0x4d5   : > { %1947 = vmatpush3.bf16.msra.mxu1 %v2071_v30 }
 0x4d6   : > { %1948 = vmatprep.subr.bf16.mxu1 %v2118_v62 }
 0x4d9   : > { %1949 = vmatpush3.bf16.msra.mxu1 %v2072_v40 }
 0x4da   : > { %1950 = vmatprep.subr.bf16.mxu1 %v2118_v62  ;;  %v1769_v62 = vld [vmem:[%s2542_s14] ss:$0 sm:$0xff] }
 0x4dd   : > { %1951 = vmatpush3.bf16.msra.mxu1 %v2073_v41 }
 0x593   : > { %v1352_v32 = vpop.f32.mrb[8].mxu1 }
 0x594   : > { %v1353_v33 = vadd.f32 %v1751_v31, %v1352_v32  ;;  %v1914_v34 = vpop.f32.mrb[9].mxu1 }
 0x595   : > { %v1355_v20 = vpop.f32.mrb[10].mxu1 }
 0x596   : > { %v1356_v35 = vadd.f32 %v1751_v31, %v1355_v20  ;;  %v1915_v36 = vpop.f32.mrb[11].mxu1  ;;  %v1359_v37 = vmax.f32 %v1353_v33, 0.0 }
 0x598   : > { %v1360_v38 = vmax.f32 %v1356_v35, 0.0 }
 0x59a   : > { %v1361_v39 = vpack.c.bf16 %v1360_v38, %v1359_v37 }
 0x59c   : > { %1933 = vmatmul.mubr.bf16.vlgmr.msra.gmra.mrb[8].mxu0 %v1361_v39 }
 0x66f   : > { %v1467_v43 = vpop.f32.mrb[8].mxu0 }
 0x670   : > { %v1468_v44 = vadd.f32 %v1760_v42, %v1467_v43  ;;  %v1934_v45 = vpop.f32.mrb[9].mxu0 }
 0x671   : > { %v1470_v46 = vpop.f32.mrb[10].mxu0 }
 0x672   : > { %v1471_v47 = vadd.f32 %v1760_v42, %v1470_v46  ;;  %v1935_v48 = vpop.f32.mrb[11].mxu0  ;;  %v1474_v49 = vmax.f32 %v1468_v44, 0.0 }
 0x674   : > { %v1475_v50 = vmax.f32 %v1471_v47, 0.0 }
 0x676   : > { %v1476_v51 = vpack.c.bf16 %v1475_v50, %v1474_v49 }
 0x678   : > { %1953 = vmatmul.mubr.bf16.vlgmr.msra.gmra.mrb[12].mxu1 %v1476_v51 }
 0x74b   : > { %v1582_v52 = vpop.f32.mrb[12].mxu1 }
 0x74c   : > { %v1583_v53 = vadd.f32 %v1769_v62, %v1582_v52  ;;  %v1954_v54 = vpop.f32.mrb[13].mxu1 }
 0x74d   : > { %v1585_v55 = vpop.f32.mrb[14].mxu1 }
 0x74e   : > { %1589 = vst.msk [vmem:[%s566_s27] sm:$0xff] %vm930_vm2, %v1583_v53  ;;  %v1586_v56 = vadd.f32 %v1769_v62, %v1585_v55  ;;  %v1955_v57 = vpop.f32.mrb[15].mxu1 }
 0x750   : > { %1590 = vst.msk [vmem:[%s566_s27 + $0x8] sm:$0xff] %vm930_vm2, %v1586_v56 }
 0x751 PF: > { %s25_s22 = sadd.s32 1, %s2112_s22   ;;  %s2546_s28 = sld [smem:[#allocation2_spill]] }
 0x752   : > { %p22_p7 = scmp.ge.s32.totalorder %s25_s22, 6   ;;  %s2547_s29 = sld [smem:[#allocation3_spill]] }
 0x753   : > { %s2548_s18 = smov %s2104_s20  ;;  %s2549_s19 = smov %s2108_s21 }
 0x754   :  { %24 = sbr.rel (!%p22_p7) target bundleno = 3 (0x3), region = 116 }
 0x757   : > { %s2550_s20 = smov %s2546_s28 }
 0x758   : > { %s2551_s21 = smov %s2547_s29 }

</bundles_post_ra>
